<compile_context>
chip_gen: v6e
topology: v6e:2x2x1
jax: 0.10.0
libtpu: 0.0.40
codegen_flags: <defaults>
</compile_context>

<pallas_src>
import math

import jax
import jax.numpy as jnp
from jax.experimental import pallas as pl
from jax.experimental.pallas import tpu as pltpu

# ----------------------- model sizes (small, synthetic) -----------------------
B = 2          # batch
N = 8          # sequence length
D = 32         # hidden size (embed_dim)
H = 4          # num attention heads
HD = D // H    # head_dim
A = 4          # adapter_len (prefix length)
V = 128        # vocab size
LD = 6         # document (encoder input) length
DENC = 16      # encoder hidden size
F = 64         # MLP intermediate size

# power-of-two so batch/head indices come from cheap shifts/ands inside the kernel
assert HD & (HD - 1) == 0 and N & (N - 1) == 0 and A & (A - 1) == 0 and B & (B - 1) == 0
LOG2_HD = HD.bit_length() - 1
LOG2_N = N.bit_length() - 1

IGNORE = -100  # CrossEntropyLoss ignore_index


# ------------------------------ shared helpers --------------------------------
def _full_spec(shape):
    nd = len(shape)
    return pl.BlockSpec(shape, lambda *_: (0,) * nd)


_SMEM_SPEC = pl.BlockSpec(memory_space=pltpu.MemorySpace.SMEM)


def _rmsnorm(x, w, eps=1e-6):
    var = jnp.mean(x * x, axis=-1, keepdims=True)
    return x * jax.lax.rsqrt(var + eps) * w


def _softmax_lastdim(s):
    s = s - jnp.max(s, axis=-1, keepdims=True)
    p = jnp.exp(s)
    return p * pl.reciprocal(jnp.sum(p, axis=-1, keepdims=True), approx=True)


def _mx(a, b):
    """a @ b with bf16 MXU feeds, f32 accumulation."""
    return jnp.dot(a.astype(jnp.bfloat16), b.astype(jnp.bfloat16),
                   preferred_element_type=jnp.float32)


def _mx_nt(a, b):
    """a @ b.T with bf16 MXU feeds, f32 accumulation."""
    return jax.lax.dot_general(a.astype(jnp.bfloat16), b.astype(jnp.bfloat16),
                               (((1,), (1,)), ((), ())),
                               preferred_element_type=jnp.float32)


# --------------- fully fused decoder + ref pass + lm_head + CE kernel ----------
def _make_kernel(has_prefix, want_ref, want_loss):
    """Build a kernel for the chosen flag combination (static Python flags)."""

    def kernel(*refs):
        it = iter(refs)
        # ---- inputs ----
        x_ref = next(it)
        if has_prefix:
            pooled_ref = next(it)
            proj_ref = next(it)
        wqkv_ref = next(it)
        wo_ref = next(it)
        wgu_ref = next(it)
        wd_ref = next(it)
        lmh_ref = next(it)
        n1_ref = next(it)
        n2_ref = next(it)
        n3_ref = next(it)
        if has_prefix:
            gate_ref = next(it)      # SMEM (1,) f32
        if want_loss:
            lbl_ref = next(it)       # SMEM (M,) int32 (pre-shifted, IGNORE padded)
        # ---- outputs ----
        logits_ref = next(it)                         # (M, V) f32
        if want_ref:
            ref_ref = next(it)                        # (M, V) bf16
        if want_loss:
            loss_ref = next(it)                       # (1, 1) f32
        # ---- scratch ----
        if has_prefix:
            pref_scr = next(it)                       # VMEM (A*B, D) f32

        x = x_ref[...]                                # (M, D) f32 residual stream
        Mx = x.shape[0]
        scale = 1.0 / math.sqrt(HD)

        # ---- shared attention prologue (one RMSNorm + one fused QKV matmul) ----
        h = _rmsnorm(x, n1_ref[...])
        qkv = _mx(h, wqkv_ref[...])                   # (M, 3D)
        q = qkv[:, 0:D]
        k = qkv[:, D:2 * D]
        v = qkv[:, 2 * D:3 * D]

        # per-lane head id (per-head masking of K/V, no lane-sparse reshapes)
        lane = jax.lax.broadcasted_iota(jnp.int32, (1, D), 1)
        lane_head = jnp.right_shift(lane, LOG2_HD)                       # (1, D)
        # causal + same-batch mask over flattened (B*N) query/key axes (built once)
        r = jax.lax.broadcasted_iota(jnp.int32, (Mx, Mx), 0)
        c = jax.lax.broadcasted_iota(jnp.int32, (Mx, Mx), 1)
        allowed = (jnp.right_shift(r, LOG2_N) == jnp.right_shift(c, LOG2_N)) & (c <= r)

        if has_prefix:
            gate = gate_ref[0]
            # ---- fused KnowEncoder projection ----
            # adaption_prompt rows in a-major (a*B + b) order, assembled through a
            # tiny VMEM scratch (sub-tile stores) to avoid lane->sublane reshapes.
            pref_flat = _mx(pooled_ref[...], proj_ref[...])              # (B, A*D)
            for a in range(A):
                pref_scr[a * B:(a + 1) * B, :] = pref_flat[:, a * D:(a + 1) * D]
            prefix = pref_scr[...]                                       # (A*B, D)
            # adapter_k / adapter_v = k_proj / v_proj(adaption_prompt)
            akv = _mx(prefix, wqkv_ref[...])                             # (A*B, 3D)
            ak = akv[:, D:2 * D]
            av = akv[:, 2 * D:3 * D]
            AB = A * B
            ra = jax.lax.broadcasted_iota(jnp.int32, (Mx, AB), 0)
            ca = jax.lax.broadcasted_iota(jnp.int32, (Mx, AB), 1)
            # query batch (row >> log2 N) must match adapter batch (col & (B-1))
            ad_same = jnp.right_shift(ra, LOG2_N) == (ca & (B - 1))

        heads = jnp.zeros((Mx, D), jnp.float32)                 # adapted (or base)
        heads_base = jnp.zeros((Mx, D), jnp.float32) if want_ref else None

        for hi in range(H):                    # static unroll: one pass per head
            mh = (lane_head == hi).astype(jnp.float32)                   # (1, D)
            kh = k * mh
            vh = v * mh
            # base causal attention — shared by the adapted and the ref pass
            sb = jnp.where(allowed, _mx_nt(q, kh) * scale, -1e30)        # (M, M)
            pb = _softmax_lastdim(sb)
            out_base = _mx(pb, vh)             # head-hi lanes only
            if has_prefix:
                # gated adapter attention (EncoderAdaptedAttention.forward)
                akh = ak * mh
                avh = av * mh
                sa = jnp.where(ad_same, _mx_nt(q, akh) * scale, -1e30)   # (M, A*B)
                pa = _softmax_lastdim(sa)
                heads = heads + out_base + gate * _mx(pa, avh)
                if want_ref:
                    heads_base = heads_base + out_base
            else:
                heads = heads + out_base

        # adding adapter head outputs before o_proj == `output + o_proj(adapter_out)`
        # because LLaMA's o_proj has no bias.
        def tail(heads_h):
            x1 = x + _mx(heads_h, wo_ref[...])
            h2 = _rmsnorm(x1, n2_ref[...])
            gu = _mx(h2, wgu_ref[...])                                   # (M, 2F)
            g = gu[:, 0:F]
            u = gu[:, F:2 * F]
            # silu via EUP exp + approx reciprocal (no full-precision divide)
            act = g * pl.reciprocal(1.0 + jnp.exp(-g), approx=True) * u
            x3 = x1 + _mx(act, wd_ref[...])
            xf = _rmsnorm(x3, n3_ref[...])
            return _mx(xf, lmh_ref[...])                                 # (M, V)

        logits = tail(heads)
        logits_ref[...] = logits
        if want_ref:
            ref_ref[...] = tail(heads_base).astype(jnp.bfloat16)

        if want_loss:
            # fused shifted cross entropy (torch.nn.CrossEntropyLoss semantics,
            # ignore_index rows skipped; all-ignored -> 0/0 like torch).
            col = jax.lax.broadcasted_iota(jnp.int32, (Mx, V), 1)
            ri = jax.lax.broadcasted_iota(jnp.int32, (Mx, 1), 0)
            lbl_col = jnp.full((Mx, 1), IGNORE, jnp.int32)
            for m in range(Mx):                # M scalar SMEM reads + selects
                lbl_col = jnp.where(ri == m, lbl_ref[m], lbl_col)
            mxr = jnp.max(logits, axis=-1, keepdims=True)
            lse = mxr + jnp.log(jnp.sum(jnp.exp(logits - mxr), axis=-1, keepdims=True))
            tgt = jnp.sum(jnp.where(col == lbl_col, logits, 0.0),
                          axis=-1, keepdims=True)                        # gather-by-mask
            valid = (lbl_col >= 0).astype(jnp.float32)
            per_row = (lse - tgt) * valid
            loss_ref[...] = (jnp.sum(per_row, axis=(0, 1), keepdims=True)
                             / jnp.sum(valid, axis=(0, 1), keepdims=True))

    return kernel


def fused_forward(lm, x2, pooled=None, proj=None, gate=None, labels_flat=None,
                  want_ref=False):
    """Single pallas_call: adapted logits [+ ref logits] [+ CE loss]."""
    Mx = x2.shape[0]
    has_prefix = pooled is not None
    want_loss = labels_flat is not None
    want_ref_out = want_ref and has_prefix    # without a prefix both passes coincide

    in_specs = [_full_spec((Mx, D))]
    inputs = [x2]
    if has_prefix:
        in_specs += [_full_spec((B, DENC)), _full_spec((DENC, A * D))]
        inputs += [pooled, proj]
    in_specs += [_full_spec((D, 3 * D)), _full_spec((D, D)), _full_spec((D, 2 * F)),
                 _full_spec((F, D)), _full_spec((D, V)),
                 _full_spec((1, D)), _full_spec((1, D)), _full_spec((1, D))]
    inputs += [lm['wqkv'], lm['wo'], lm['wgu'], lm['wd'], lm['lm_head'],
               lm['attn_norm'], lm['mlp_norm'], lm['final_norm']]
    if has_prefix:
        in_specs.append(_SMEM_SPEC)            # adaption_gate
        inputs.append(gate)
    if want_loss:
        in_specs.append(_SMEM_SPEC)            # shifted labels, int32
        inputs.append(labels_flat)

    out_shape = [jax.ShapeDtypeStruct((Mx, V), jnp.float32)]
    out_specs = [_full_spec((Mx, V))]
    if want_ref_out:
        out_shape.append(jax.ShapeDtypeStruct((Mx, V), jnp.bfloat16))
        out_specs.append(_full_spec((Mx, V)))
    if want_loss:
        out_shape.append(jax.ShapeDtypeStruct((1, 1), jnp.float32))
        out_specs.append(_full_spec((1, 1)))

    scratch_shapes = [pltpu.VMEM((A * B, D), jnp.float32)] if has_prefix else []

    outs = pl.pallas_call(
        _make_kernel(has_prefix, want_ref_out, want_loss),
        out_shape=tuple(out_shape),
        grid=(1,),
        in_specs=in_specs,
        out_specs=tuple(out_specs),
        scratch_shapes=scratch_shapes,
        compiler_params=pltpu.CompilerParams(dimension_semantics=("arbitrary",)),
    )(*inputs)

    if not isinstance(outs, (tuple, list)):
        outs = (outs,)
    outs = list(outs)
    logits = outs.pop(0)
    ref_logits = outs.pop(0) if want_ref_out else None
    loss = outs.pop(0)[0, 0] if want_loss else None
    return logits, ref_logits, loss


# --------------------------- glue (gathers / shifts) ---------------------------
def _shift_labels_flat(labels):
    """labels (B,N) -> flat (B*N,) where row b*N+t holds labels[b,t+1], last=IGNORE."""
    pad = jnp.full((labels.shape[0], 1), IGNORE, jnp.int32)
    shifted = jnp.concatenate([labels[:, 1:].astype(jnp.int32), pad], axis=1)
    return shifted.reshape(-1)


def enc_pool(pe, doc_tokens):
    """KnowEncoder stand-in: embedding gather + mean pool (XLA glue)."""
    e = pe['embed'][doc_tokens]                 # (B, LD, DENC) gather
    return jnp.mean(e, axis=1)                  # (B, DENC)


# ------------------------------ EncTunedLM.forward -----------------------------
def enc_tuned_lm_forward(params, tokens, Doc_tokens=None, k=1, use_ref=False, stage=1):
    """Mirrors EncTunedLM.forward -> (ref_logp, (lm_logits, loss))."""
    lm = params['lm']
    input_ids = tokens['input_ids']
    b, n = input_ids.shape

    # embedding lookup (gather) stays as XLA glue
    x2 = lm['embed'][input_ids].astype(jnp.float32).reshape(b * n, D)

    labels = tokens.get('labels', None)
    labels_flat = _shift_labels_flat(labels) if labels is not None else None

    if Doc_tokens is not None:
        # Enc.forward(Doc_tokens, stage): pooled encoder states; projection fused in-kernel
        pooled = enc_pool(params['enc'], Doc_tokens)
        proj = params['enc']['proj']
        gate = lm['adaption_gate']
    else:
        pooled = proj = gate = None

    # _set_prefix + model.forward + _del_prefix + (optional) no-prefix ref pass,
    # all inside ONE fused pallas_call (plus the shifted CE).
    logits2, ref2, loss = fused_forward(lm, x2, pooled, proj, gate, labels_flat,
                                        want_ref=use_ref)
    lm_logits = logits2.reshape(b, n, V)

    ref_logp = None
    if use_ref:
        # after _del_prefix the second (no-grad) pass runs WITHOUT the adapter prefix
        ref_logp = (ref2.reshape(b, n, V) if ref2 is not None
                    else lm_logits.astype(jnp.bfloat16))
    return ref_logp, (lm_logits, loss)


# ------------------------------- parameter init --------------------------------
def init_params(key):
    ks = jax.random.split(key, 12)
    s = 0.02
    wq = jax.random.normal(ks[1], (D, D), jnp.float32) * s
    wk = jax.random.normal(ks[2], (D, D), jnp.float32) * s
    wv = jax.random.normal(ks[3], (D, D), jnp.float32) * s
    wg = jax.random.normal(ks[5], (D, F), jnp.float32) * s
    wu = jax.random.normal(ks[6], (D, F), jnp.float32) * s
    lm = {
        'embed':      jax.random.normal(ks[0], (V, D), jnp.float32) * s,
        # matmul weights stored bf16 (MXU-native feed, half the DMA bytes)
        'wqkv':       jnp.concatenate([wq, wk, wv], axis=1).astype(jnp.bfloat16),
        'wo':         (jax.random.normal(ks[4], (D, D), jnp.float32) * s).astype(jnp.bfloat16),
        'wgu':        jnp.concatenate([wg, wu], axis=1).astype(jnp.bfloat16),
        'wd':         (jax.random.normal(ks[7], (F, D), jnp.float32) * s).astype(jnp.bfloat16),
        'lm_head':    (jax.random.normal(ks[8], (D, V), jnp.float32) * s).astype(jnp.bfloat16),
        'attn_norm':  jnp.ones((1, D), jnp.float32),
        'mlp_norm':   jnp.ones((1, D), jnp.float32),
        'final_norm': jnp.ones((1, D), jnp.float32),
        # peft initializes adaption_gate to zeros(1); use a nonzero deterministic
        # value so the adapter path contributes in this synthetic test.
        'adaption_gate': jnp.full((1,), 0.5, jnp.float32),
    }
    enc = {
        'embed': jax.random.normal(ks[9], (V, DENC), jnp.float32) * s,
        'proj':  (jax.random.normal(ks[10], (DENC, A * D), jnp.float32) * s).astype(jnp.bfloat16),
    }
    return {'lm': lm, 'enc': enc}


# ------------------------------------ main --------------------------------------
if __name__ == "__main__":
    key = jax.random.PRNGKey(0)
    kp, k1, k2 = jax.random.split(key, 3)
    params = init_params(kp)

    input_ids = jax.random.randint(k1, (B, N), 0, V, dtype=jnp.int32)
    labels = input_ids                                   # teacher forcing
    doc_tokens = jax.random.randint(k2, (B, LD), 0, V, dtype=jnp.int32)
    tokens = {'input_ids': input_ids, 'labels': labels}

    fwd = jax.jit(enc_tuned_lm_forward, static_argnames=('k', 'use_ref', 'stage'))
    ref_logp, (lm_logits, loss) = fwd(params, tokens, doc_tokens, use_ref=True)

    jax.block_until_ready((ref_logp, lm_logits, loss))
    assert lm_logits.shape == (B, N, V) and lm_logits.dtype == jnp.float32
    assert ref_logp.shape == (B, N, V) and ref_logp.dtype == jnp.bfloat16
    assert loss.shape == () and bool(jnp.isfinite(loss))
    print("KERNEL_OK")
</pallas_src>

<mosaic_0001>
module attributes {stable_mosaic.version = 11 : i64} {
  func.func @kernel(%arg0: i32, %arg1: memref<16x32xf32, #tpu.memory_space<vmem>>, %arg2: memref<2x16xf32, #tpu.memory_space<vmem>>, %arg3: memref<16x128xbf16, #tpu.memory_space<vmem>>, %arg4: memref<32x96xbf16, #tpu.memory_space<vmem>>, %arg5: memref<32x32xbf16, #tpu.memory_space<vmem>>, %arg6: memref<32x128xbf16, #tpu.memory_space<vmem>>, %arg7: memref<64x32xbf16, #tpu.memory_space<vmem>>, %arg8: memref<32x128xbf16, #tpu.memory_space<vmem>>, %arg9: memref<1x32xf32, #tpu.memory_space<vmem>>, %arg10: memref<1x32xf32, #tpu.memory_space<vmem>>, %arg11: memref<1x32xf32, #tpu.memory_space<vmem>>, %arg12: memref<1xf32, #tpu.memory_space<smem>>, %arg13: memref<16xi32, #tpu.memory_space<smem>>, %arg14: memref<16x128xf32, #tpu.memory_space<vmem>>, %arg15: memref<16x128xbf16, #tpu.memory_space<vmem>>, %arg16: memref<1x1xf32, #tpu.memory_space<vmem>>, %arg17: memref<8x32xf32, #tpu.memory_space<vmem>>) attributes {dimension_semantics = [#tpu.dimension_semantics<arbitrary>], iteration_bounds = array<i64: 1>, scalar_prefetch = 0 : i64, scratch_operands = 1 : i64, tpu.core_type = #tpu.core_type<tc>, window_params = [{pipeline_mode = #tpu.pipeline_mode<synchronous>, transform_indices = @transform_0, window_bounds = array<i64: 16, 32>}, {pipeline_mode = #tpu.pipeline_mode<synchronous>, transform_indices = @transform_1, window_bounds = array<i64: 2, 16>}, {pipeline_mode = #tpu.pipeline_mode<synchronous>, transform_indices = @transform_2, window_bounds = array<i64: 16, 128>}, {pipeline_mode = #tpu.pipeline_mode<synchronous>, transform_indices = @transform_3, window_bounds = array<i64: 32, 96>}, {pipeline_mode = #tpu.pipeline_mode<synchronous>, transform_indices = @transform_4, window_bounds = array<i64: 32, 32>}, {pipeline_mode = #tpu.pipeline_mode<synchronous>, transform_indices = @transform_5, window_bounds = array<i64: 32, 128>}, {pipeline_mode = #tpu.pipeline_mode<synchronous>, transform_indices = @transform_6, window_bounds = array<i64: 64, 32>}, {pipeline_mode = #tpu.pipeline_mode<synchronous>, transform_indices = @transform_7, window_bounds = array<i64: 32, 128>}, {pipeline_mode = #tpu.pipeline_mode<synchronous>, transform_indices = @transform_8, window_bounds = array<i64: 1, 32>}, {pipeline_mode = #tpu.pipeline_mode<synchronous>, transform_indices = @transform_9, window_bounds = array<i64: 1, 32>}, {pipeline_mode = #tpu.pipeline_mode<synchronous>, transform_indices = @transform_10, window_bounds = array<i64: 1, 32>}, {transform_indices = @transform_11, window_bounds = array<i64: 1>}, {transform_indices = @transform_12, window_bounds = array<i64: 16>}, {pipeline_mode = #tpu.pipeline_mode<synchronous>, transform_indices = @transform_13, window_bounds = array<i64: 16, 128>}, {pipeline_mode = #tpu.pipeline_mode<synchronous>, transform_indices = @transform_14, window_bounds = array<i64: 16, 128>}, {pipeline_mode = #tpu.pipeline_mode<synchronous>, transform_indices = @transform_15, window_bounds = array<i64: 1, 1>}]} {
    %c0 = arith.constant 0 : index
    %c0_0 = arith.constant 0 : index
    %0 = vector.load %arg1[%c0, %c0_0] : memref<16x32xf32, #tpu.memory_space<vmem>>, vector<16x32xf32>
    %c0_1 = arith.constant 0 : index
    %c0_2 = arith.constant 0 : index
    %1 = vector.load %arg9[%c0_1, %c0_2] : memref<1x32xf32, #tpu.memory_space<vmem>>, vector<1x32xf32>
    %2 = arith.mulf %0, %0 : vector<16x32xf32>
    %cst = arith.constant dense<0.000000e+00> : vector<16xf32>
    %3 = vector.multi_reduction <add>, %2, %cst [1] : vector<16x32xf32> to vector<16xf32>
    %4 = vector.shape_cast %3 : vector<16xf32> to vector<16x1xf32>
    %cst_3 = arith.constant 3.200000e+01 : f32
    %5 = vector.broadcast %cst_3 : f32 to vector<16x1xf32>
    %6 = arith.divf %4, %5 : vector<16x1xf32>
    %cst_4 = arith.constant 9.99999997E-7 : f32
    %7 = vector.broadcast %cst_4 : f32 to vector<16x1xf32>
    %8 = arith.addf %6, %7 : vector<16x1xf32>
    %9 = math.rsqrt %8 : vector<16x1xf32>
    %10 = vector.broadcast %9 : vector<16x1xf32> to vector<16x32xf32>
    %11 = arith.mulf %0, %10 : vector<16x32xf32>
    %12 = vector.broadcast %1 : vector<1x32xf32> to vector<16x32xf32>
    %13 = arith.mulf %11, %12 : vector<16x32xf32>
    %c0_5 = arith.constant 0 : index
    %c0_6 = arith.constant 0 : index
    %14 = vector.load %arg4[%c0_5, %c0_6] : memref<32x96xbf16, #tpu.memory_space<vmem>>, vector<32x96xbf16>
    %15 = arith.truncf %13 : vector<16x32xf32> to vector<16x32xbf16>
    %cst_7 = arith.constant dense<0.000000e+00> : vector<16x96xf32>
    %16 = tpu.matmul %15, %14, %cst_7 {dimension_numbers = #tpu.dot_dimension_numbers<[1], [0], [0], [1], [0, 0, 1, 1], [], []>} : vector<16x32xbf16>, vector<32x96xbf16>, vector<16x96xf32> -> vector<16x96xf32>
    %17 = vector.extract_strided_slice %16 {offsets = [0, 0], sizes = [16, 32], strides = [1, 1]} : vector<16x96xf32> to vector<16x32xf32>
    %18 = vector.extract_strided_slice %16 {offsets = [0, 32], sizes = [16, 32], strides = [1, 1]} : vector<16x96xf32> to vector<16x32xf32>
    %19 = vector.extract_strided_slice %16 {offsets = [0, 64], sizes = [16, 32], strides = [1, 1]} : vector<16x96xf32> to vector<16x32xf32>
    %20 = tpu.iota {dimensions = array<i32: 1>} : vector<1x32xi32>
    %c3_i32 = arith.constant 3 : i32
    %21 = vector.broadcast %c3_i32 : i32 to vector<1x32xi32>
    %22 = arith.shrsi %20, %21 : vector<1x32xi32>
    %23 = tpu.iota {dimensions = array<i32: 0>} : vector<16x16xi32>
    %24 = tpu.iota {dimensions = array<i32: 1>} : vector<16x16xi32>
    %c3_i32_8 = arith.constant 3 : i32
    %25 = vector.broadcast %c3_i32_8 : i32 to vector<16x16xi32>
    %26 = arith.shrsi %23, %25 : vector<16x16xi32>
    %c3_i32_9 = arith.constant 3 : i32
    %27 = vector.broadcast %c3_i32_9 : i32 to vector<16x16xi32>
    %28 = arith.shrsi %24, %27 : vector<16x16xi32>
    %29 = arith.cmpi eq, %26, %28 : vector<16x16xi32>
    %30 = arith.cmpi sle, %24, %23 : vector<16x16xi32>
    %31 = arith.andi %29, %30 : vector<16x16xi1>
    %c0_10 = arith.constant 0 : index
    %32 = memref.load %arg12[%c0_10] : memref<1xf32, #tpu.memory_space<smem>>
    %c0_11 = arith.constant 0 : index
    %c0_12 = arith.constant 0 : index
    %33 = vector.load %arg2[%c0_11, %c0_12] : memref<2x16xf32, #tpu.memory_space<vmem>>, vector<2x16xf32>
    %c0_13 = arith.constant 0 : index
    %c0_14 = arith.constant 0 : index
    %34 = vector.load %arg3[%c0_13, %c0_14] : memref<16x128xbf16, #tpu.memory_space<vmem>>, vector<16x128xbf16>
    %35 = arith.truncf %33 : vector<2x16xf32> to vector<2x16xbf16>
    %cst_15 = arith.constant dense<0.000000e+00> : vector<2x128xf32>
    %36 = tpu.matmul %35, %34, %cst_15 {dimension_numbers = #tpu.dot_dimension_numbers<[1], [0], [0], [1], [0, 0, 1, 1], [], []>} : vector<2x16xbf16>, vector<16x128xbf16>, vector<2x128xf32> -> vector<2x128xf32>
    %37 = vector.extract_strided_slice %36 {offsets = [0, 0], sizes = [2, 32], strides = [1, 1]} : vector<2x128xf32> to vector<2x32xf32>
    %c0_16 = arith.constant 0 : index
    %c0_17 = arith.constant 0 : index
    %38 = vector.load %arg17[%c0_16, %c0_17] : memref<8x32xf32, #tpu.memory_space<vmem>>, vector<2x32xf32>
    tpu.vector_store %arg17[%c0_16, %c0_17], %37 {strides = array<i32>} : memref<8x32xf32, #tpu.memory_space<vmem>>, vector<2x32xf32>,
    %39 = vector.extract_strided_slice %36 {offsets = [0, 32], sizes = [2, 32], strides = [1, 1]} : vector<2x128xf32> to vector<2x32xf32>
    %c2 = arith.constant 2 : index
    %c0_18 = arith.constant 0 : index
    %40 = vector.load %arg17[%c2, %c0_18] : memref<8x32xf32, #tpu.memory_space<vmem>>, vector<2x32xf32>
    tpu.vector_store %arg17[%c2, %c0_18], %39 {strides = array<i32>} : memref<8x32xf32, #tpu.memory_space<vmem>>, vector<2x32xf32>,
    %41 = vector.extract_strided_slice %36 {offsets = [0, 64], sizes = [2, 32], strides = [1, 1]} : vector<2x128xf32> to vector<2x32xf32>
    %c4 = arith.constant 4 : index
    %c0_19 = arith.constant 0 : index
    %42 = vector.load %arg17[%c4, %c0_19] : memref<8x32xf32, #tpu.memory_space<vmem>>, vector<2x32xf32>
    tpu.vector_store %arg17[%c4, %c0_19], %41 {strides = array<i32>} : memref<8x32xf32, #tpu.memory_space<vmem>>, vector<2x32xf32>,
    %43 = vector.extract_strided_slice %36 {offsets = [0, 96], sizes = [2, 32], strides = [1, 1]} : vector<2x128xf32> to vector<2x32xf32>
    %c6 = arith.constant 6 : index
    %c0_20 = arith.constant 0 : index
    %44 = vector.load %arg17[%c6, %c0_20] : memref<8x32xf32, #tpu.memory_space<vmem>>, vector<2x32xf32>
    tpu.vector_store %arg17[%c6, %c0_20], %43 {strides = array<i32>} : memref<8x32xf32, #tpu.memory_space<vmem>>, vector<2x32xf32>,
    %c0_21 = arith.constant 0 : index
    %c0_22 = arith.constant 0 : index
    %45 = vector.load %arg17[%c0_21, %c0_22] : memref<8x32xf32, #tpu.memory_space<vmem>>, vector<8x32xf32>
    %c0_23 = arith.constant 0 : index
    %c0_24 = arith.constant 0 : index
    %46 = vector.load %arg4[%c0_23, %c0_24] : memref<32x96xbf16, #tpu.memory_space<vmem>>, vector<32x96xbf16>
    %47 = arith.truncf %45 : vector<8x32xf32> to vector<8x32xbf16>
    %cst_25 = arith.constant dense<0.000000e+00> : vector<8x96xf32>
    %48 = tpu.matmul %47, %46, %cst_25 {dimension_numbers = #tpu.dot_dimension_numbers<[1], [0], [0], [1], [0, 0, 1, 1], [], []>} : vector<8x32xbf16>, vector<32x96xbf16>, vector<8x96xf32> -> vector<8x96xf32>
    %49 = vector.extract_strided_slice %48 {offsets = [0, 32], sizes = [8, 32], strides = [1, 1]} : vector<8x96xf32> to vector<8x32xf32>
    %50 = vector.extract_strided_slice %48 {offsets = [0, 64], sizes = [8, 32], strides = [1, 1]} : vector<8x96xf32> to vector<8x32xf32>
    %51 = tpu.iota {dimensions = array<i32: 0>} : vector<16x8xi32>
    %52 = tpu.iota {dimensions = array<i32: 1>} : vector<16x8xi32>
    %c3_i32_26 = arith.constant 3 : i32
    %53 = vector.broadcast %c3_i32_26 : i32 to vector<16x8xi32>
    %54 = arith.shrsi %51, %53 : vector<16x8xi32>
    %c1_i32 = arith.constant 1 : i32
    %55 = vector.broadcast %c1_i32 : i32 to vector<16x8xi32>
    %56 = arith.andi %52, %55 : vector<16x8xi32>
    %57 = arith.cmpi eq, %54, %56 : vector<16x8xi32>
    %cst_27 = arith.constant 0.000000e+00 : f32
    %58 = vector.broadcast %cst_27 : f32 to vector<16x32xf32>
    %cst_28 = arith.constant 0.000000e+00 : f32
    %59 = vector.broadcast %cst_28 : f32 to vector<16x32xf32>
    %c0_i32 = arith.constant 0 : i32
    %60 = vector.broadcast %c0_i32 : i32 to vector<1x32xi32>
    %61 = arith.cmpi eq, %22, %60 : vector<1x32xi32>
    %62 = arith.extui %61 : vector<1x32xi1> to vector<1x32xi32>
    %63 = arith.sitofp %62 : vector<1x32xi32> to vector<1x32xf32>
    %64 = vector.broadcast %63 : vector<1x32xf32> to vector<16x32xf32>
    %65 = arith.mulf %18, %64 : vector<16x32xf32>
    %66 = vector.broadcast %63 : vector<1x32xf32> to vector<16x32xf32>
    %67 = arith.mulf %19, %66 : vector<16x32xf32>
    %68 = arith.truncf %17 : vector<16x32xf32> to vector<16x32xbf16>
    %69 = arith.truncf %65 : vector<16x32xf32> to vector<16x32xbf16>
    %cst_29 = arith.constant dense<0.000000e+00> : vector<16x16xf32>
    %70 = tpu.matmul %68, %69, %cst_29 {dimension_numbers = #tpu.dot_dimension_numbers<[1], [1], [0], [0], [0, 0, 1, 0], [], []>} : vector<16x32xbf16>, vector<16x32xbf16>, vector<16x16xf32> -> vector<16x16xf32>
    %cst_30 = arith.constant 0.353553385 : f32
    %71 = vector.broadcast %cst_30 : f32 to vector<16x16xf32>
    %72 = arith.mulf %70, %71 : vector<16x16xf32>
    %cst_31 = arith.constant -1.000000e+30 : f32
    %73 = vector.broadcast %cst_31 : f32 to vector<16x16xf32>
    %74 = arith.select %31, %72, %73 : vector<16x16xi1>, vector<16x16xf32>
    %cst_32 = arith.constant dense<0xFF800000> : vector<16xf32>
    %75 = vector.multi_reduction <maximumf>, %74, %cst_32 [1] : vector<16x16xf32> to vector<16xf32>
    %76 = vector.shape_cast %75 : vector<16xf32> to vector<16x1xf32>
    %77 = vector.broadcast %76 : vector<16x1xf32> to vector<16x16xf32>
    %78 = arith.subf %74, %77 : vector<16x16xf32>
    %79 = math.exp %78 : vector<16x16xf32>
    %cst_33 = arith.constant dense<0.000000e+00> : vector<16xf32>
    %80 = vector.multi_reduction <add>, %79, %cst_33 [1] : vector<16x16xf32> to vector<16xf32>
    %81 = vector.shape_cast %80 : vector<16xf32> to vector<16x1xf32>
    %82 = tpu.reciprocal %81 {approx = true} : vector<16x1xf32> -> vector<16x1xf32>
    %83 = vector.broadcast %82 : vector<16x1xf32> to vector<16x16xf32>
    %84 = arith.mulf %79, %83 : vector<16x16xf32>
    %85 = arith.truncf %84 : vector<16x16xf32> to vector<16x16xbf16>
    %86 = arith.truncf %67 : vector<16x32xf32> to vector<16x32xbf16>
    %cst_34 = arith.constant dense<0.000000e+00> : vector<16x32xf32>
    %87 = tpu.matmul %85, %86, %cst_34 {dimension_numbers = #tpu.dot_dimension_numbers<[1], [0], [0], [1], [0, 0, 1, 1], [], []>} : vector<16x16xbf16>, vector<16x32xbf16>, vector<16x32xf32> -> vector<16x32xf32>
    %88 = vector.broadcast %63 : vector<1x32xf32> to vector<8x32xf32>
    %89 = arith.mulf %49, %88 : vector<8x32xf32>
    %90 = vector.broadcast %63 : vector<1x32xf32> to vector<8x32xf32>
    %91 = arith.mulf %50, %90 : vector<8x32xf32>
    %92 = arith.truncf %17 : vector<16x32xf32> to vector<16x32xbf16>
    %93 = arith.truncf %89 : vector<8x32xf32> to vector<8x32xbf16>
    %cst_35 = arith.constant dense<0.000000e+00> : vector<16x8xf32>
    %94 = tpu.matmul %92, %93, %cst_35 {dimension_numbers = #tpu.dot_dimension_numbers<[1], [1], [0], [0], [0, 0, 1, 0], [], []>} : vector<16x32xbf16>, vector<8x32xbf16>, vector<16x8xf32> -> vector<16x8xf32>
    %cst_36 = arith.constant 0.353553385 : f32
    %95 = vector.broadcast %cst_36 : f32 to vector<16x8xf32>
    %96 = arith.mulf %94, %95 : vector<16x8xf32>
    %cst_37 = arith.constant -1.000000e+30 : f32
    %97 = vector.broadcast %cst_37 : f32 to vector<16x8xf32>
    %98 = arith.select %57, %96, %97 : vector<16x8xi1>, vector<16x8xf32>
    %cst_38 = arith.constant dense<0xFF800000> : vector<16xf32>
    %99 = vector.multi_reduction <maximumf>, %98, %cst_38 [1] : vector<16x8xf32> to vector<16xf32>
    %100 = vector.shape_cast %99 : vector<16xf32> to vector<16x1xf32>
    %101 = vector.broadcast %100 : vector<16x1xf32> to vector<16x8xf32>
    %102 = arith.subf %98, %101 : vector<16x8xf32>
    %103 = math.exp %102 : vector<16x8xf32>
    %cst_39 = arith.constant dense<0.000000e+00> : vector<16xf32>
    %104 = vector.multi_reduction <add>, %103, %cst_39 [1] : vector<16x8xf32> to vector<16xf32>
    %105 = vector.shape_cast %104 : vector<16xf32> to vector<16x1xf32>
    %106 = tpu.reciprocal %105 {approx = true} : vector<16x1xf32> -> vector<16x1xf32>
    %107 = vector.broadcast %106 : vector<16x1xf32> to vector<16x8xf32>
    %108 = arith.mulf %103, %107 : vector<16x8xf32>
    %109 = arith.addf %58, %87 : vector<16x32xf32>
    %110 = arith.truncf %108 : vector<16x8xf32> to vector<16x8xbf16>
    %111 = arith.truncf %91 : vector<8x32xf32> to vector<8x32xbf16>
    %cst_40 = arith.constant dense<0.000000e+00> : vector<16x32xf32>
    %112 = tpu.matmul %110, %111, %cst_40 {dimension_numbers = #tpu.dot_dimension_numbers<[1], [0], [0], [1], [0, 0, 1, 1], [], []>} : vector<16x8xbf16>, vector<8x32xbf16>, vector<16x32xf32> -> vector<16x32xf32>
    %113 = vector.broadcast %32 : f32 to vector<16x32xf32>
    %114 = arith.mulf %113, %112 : vector<16x32xf32>
    %115 = arith.addf %109, %114 : vector<16x32xf32>
    %116 = arith.addf %59, %87 : vector<16x32xf32>
    %c1_i32_41 = arith.constant 1 : i32
    %117 = vector.broadcast %c1_i32_41 : i32 to vector<1x32xi32>
    %118 = arith.cmpi eq, %22, %117 : vector<1x32xi32>
    %119 = arith.extui %118 : vector<1x32xi1> to vector<1x32xi32>
    %120 = arith.sitofp %119 : vector<1x32xi32> to vector<1x32xf32>
    %121 = vector.broadcast %120 : vector<1x32xf32> to vector<16x32xf32>
    %122 = arith.mulf %18, %121 : vector<16x32xf32>
    %123 = vector.broadcast %120 : vector<1x32xf32> to vector<16x32xf32>
    %124 = arith.mulf %19, %123 : vector<16x32xf32>
    %125 = arith.truncf %17 : vector<16x32xf32> to vector<16x32xbf16>
    %126 = arith.truncf %122 : vector<16x32xf32> to vector<16x32xbf16>
    %cst_42 = arith.constant dense<0.000000e+00> : vector<16x16xf32>
    %127 = tpu.matmul %125, %126, %cst_42 {dimension_numbers = #tpu.dot_dimension_numbers<[1], [1], [0], [0], [0, 0, 1, 0], [], []>} : vector<16x32xbf16>, vector<16x32xbf16>, vector<16x16xf32> -> vector<16x16xf32>
    %cst_43 = arith.constant 0.353553385 : f32
    %128 = vector.broadcast %cst_43 : f32 to vector<16x16xf32>
    %129 = arith.mulf %127, %128 : vector<16x16xf32>
    %cst_44 = arith.constant -1.000000e+30 : f32
    %130 = vector.broadcast %cst_44 : f32 to vector<16x16xf32>
    %131 = arith.select %31, %129, %130 : vector<16x16xi1>, vector<16x16xf32>
    %cst_45 = arith.constant dense<0xFF800000> : vector<16xf32>
    %132 = vector.multi_reduction <maximumf>, %131, %cst_45 [1] : vector<16x16xf32> to vector<16xf32>
    %133 = vector.shape_cast %132 : vector<16xf32> to vector<16x1xf32>
    %134 = vector.broadcast %133 : vector<16x1xf32> to vector<16x16xf32>
    %135 = arith.subf %131, %134 : vector<16x16xf32>
    %136 = math.exp %135 : vector<16x16xf32>
    %cst_46 = arith.constant dense<0.000000e+00> : vector<16xf32>
    %137 = vector.multi_reduction <add>, %136, %cst_46 [1] : vector<16x16xf32> to vector<16xf32>
    %138 = vector.shape_cast %137 : vector<16xf32> to vector<16x1xf32>
    %139 = tpu.reciprocal %138 {approx = true} : vector<16x1xf32> -> vector<16x1xf32>
    %140 = vector.broadcast %139 : vector<16x1xf32> to vector<16x16xf32>
    %141 = arith.mulf %136, %140 : vector<16x16xf32>
    %142 = arith.truncf %141 : vector<16x16xf32> to vector<16x16xbf16>
    %143 = arith.truncf %124 : vector<16x32xf32> to vector<16x32xbf16>
    %cst_47 = arith.constant dense<0.000000e+00> : vector<16x32xf32>
    %144 = tpu.matmul %142, %143, %cst_47 {dimension_numbers = #tpu.dot_dimension_numbers<[1], [0], [0], [1], [0, 0, 1, 1], [], []>} : vector<16x16xbf16>, vector<16x32xbf16>, vector<16x32xf32> -> vector<16x32xf32>
    %145 = vector.broadcast %120 : vector<1x32xf32> to vector<8x32xf32>
    %146 = arith.mulf %49, %145 : vector<8x32xf32>
    %147 = vector.broadcast %120 : vector<1x32xf32> to vector<8x32xf32>
    %148 = arith.mulf %50, %147 : vector<8x32xf32>
    %149 = arith.truncf %17 : vector<16x32xf32> to vector<16x32xbf16>
    %150 = arith.truncf %146 : vector<8x32xf32> to vector<8x32xbf16>
    %cst_48 = arith.constant dense<0.000000e+00> : vector<16x8xf32>
    %151 = tpu.matmul %149, %150, %cst_48 {dimension_numbers = #tpu.dot_dimension_numbers<[1], [1], [0], [0], [0, 0, 1, 0], [], []>} : vector<16x32xbf16>, vector<8x32xbf16>, vector<16x8xf32> -> vector<16x8xf32>
    %cst_49 = arith.constant 0.353553385 : f32
    %152 = vector.broadcast %cst_49 : f32 to vector<16x8xf32>
    %153 = arith.mulf %151, %152 : vector<16x8xf32>
    %cst_50 = arith.constant -1.000000e+30 : f32
    %154 = vector.broadcast %cst_50 : f32 to vector<16x8xf32>
    %155 = arith.select %57, %153, %154 : vector<16x8xi1>, vector<16x8xf32>
    %cst_51 = arith.constant dense<0xFF800000> : vector<16xf32>
    %156 = vector.multi_reduction <maximumf>, %155, %cst_51 [1] : vector<16x8xf32> to vector<16xf32>
    %157 = vector.shape_cast %156 : vector<16xf32> to vector<16x1xf32>
    %158 = vector.broadcast %157 : vector<16x1xf32> to vector<16x8xf32>
    %159 = arith.subf %155, %158 : vector<16x8xf32>
    %160 = math.exp %159 : vector<16x8xf32>
    %cst_52 = arith.constant dense<0.000000e+00> : vector<16xf32>
    %161 = vector.multi_reduction <add>, %160, %cst_52 [1] : vector<16x8xf32> to vector<16xf32>
    %162 = vector.shape_cast %161 : vector<16xf32> to vector<16x1xf32>
    %163 = tpu.reciprocal %162 {approx = true} : vector<16x1xf32> -> vector<16x1xf32>
    %164 = vector.broadcast %163 : vector<16x1xf32> to vector<16x8xf32>
    %165 = arith.mulf %160, %164 : vector<16x8xf32>
    %166 = arith.addf %115, %144 : vector<16x32xf32>
    %167 = arith.truncf %165 : vector<16x8xf32> to vector<16x8xbf16>
    %168 = arith.truncf %148 : vector<8x32xf32> to vector<8x32xbf16>
    %cst_53 = arith.constant dense<0.000000e+00> : vector<16x32xf32>
    %169 = tpu.matmul %167, %168, %cst_53 {dimension_numbers = #tpu.dot_dimension_numbers<[1], [0], [0], [1], [0, 0, 1, 1], [], []>} : vector<16x8xbf16>, vector<8x32xbf16>, vector<16x32xf32> -> vector<16x32xf32>
    %170 = vector.broadcast %32 : f32 to vector<16x32xf32>
    %171 = arith.mulf %170, %169 : vector<16x32xf32>
    %172 = arith.addf %166, %171 : vector<16x32xf32>
    %173 = arith.addf %116, %144 : vector<16x32xf32>
    %c2_i32 = arith.constant 2 : i32
    %174 = vector.broadcast %c2_i32 : i32 to vector<1x32xi32>
    %175 = arith.cmpi eq, %22, %174 : vector<1x32xi32>
    %176 = arith.extui %175 : vector<1x32xi1> to vector<1x32xi32>
    %177 = arith.sitofp %176 : vector<1x32xi32> to vector<1x32xf32>
    %178 = vector.broadcast %177 : vector<1x32xf32> to vector<16x32xf32>
    %179 = arith.mulf %18, %178 : vector<16x32xf32>
    %180 = vector.broadcast %177 : vector<1x32xf32> to vector<16x32xf32>
    %181 = arith.mulf %19, %180 : vector<16x32xf32>
    %182 = arith.truncf %17 : vector<16x32xf32> to vector<16x32xbf16>
    %183 = arith.truncf %179 : vector<16x32xf32> to vector<16x32xbf16>
    %cst_54 = arith.constant dense<0.000000e+00> : vector<16x16xf32>
    %184 = tpu.matmul %182, %183, %cst_54 {dimension_numbers = #tpu.dot_dimension_numbers<[1], [1], [0], [0], [0, 0, 1, 0], [], []>} : vector<16x32xbf16>, vector<16x32xbf16>, vector<16x16xf32> -> vector<16x16xf32>
    %cst_55 = arith.constant 0.353553385 : f32
    %185 = vector.broadcast %cst_55 : f32 to vector<16x16xf32>
    %186 = arith.mulf %184, %185 : vector<16x16xf32>
    %cst_56 = arith.constant -1.000000e+30 : f32
    %187 = vector.broadcast %cst_56 : f32 to vector<16x16xf32>
    %188 = arith.select %31, %186, %187 : vector<16x16xi1>, vector<16x16xf32>
    %cst_57 = arith.constant dense<0xFF800000> : vector<16xf32>
    %189 = vector.multi_reduction <maximumf>, %188, %cst_57 [1] : vector<16x16xf32> to vector<16xf32>
    %190 = vector.shape_cast %189 : vector<16xf32> to vector<16x1xf32>
    %191 = vector.broadcast %190 : vector<16x1xf32> to vector<16x16xf32>
    %192 = arith.subf %188, %191 : vector<16x16xf32>
    %193 = math.exp %192 : vector<16x16xf32>
    %cst_58 = arith.constant dense<0.000000e+00> : vector<16xf32>
    %194 = vector.multi_reduction <add>, %193, %cst_58 [1] : vector<16x16xf32> to vector<16xf32>
    %195 = vector.shape_cast %194 : vector<16xf32> to vector<16x1xf32>
    %196 = tpu.reciprocal %195 {approx = true} : vector<16x1xf32> -> vector<16x1xf32>
    %197 = vector.broadcast %196 : vector<16x1xf32> to vector<16x16xf32>
    %198 = arith.mulf %193, %197 : vector<16x16xf32>
    %199 = arith.truncf %198 : vector<16x16xf32> to vector<16x16xbf16>
    %200 = arith.truncf %181 : vector<16x32xf32> to vector<16x32xbf16>
    %cst_59 = arith.constant dense<0.000000e+00> : vector<16x32xf32>
    %201 = tpu.matmul %199, %200, %cst_59 {dimension_numbers = #tpu.dot_dimension_numbers<[1], [0], [0], [1], [0, 0, 1, 1], [], []>} : vector<16x16xbf16>, vector<16x32xbf16>, vector<16x32xf32> -> vector<16x32xf32>
    %202 = vector.broadcast %177 : vector<1x32xf32> to vector<8x32xf32>
    %203 = arith.mulf %49, %202 : vector<8x32xf32>
    %204 = vector.broadcast %177 : vector<1x32xf32> to vector<8x32xf32>
    %205 = arith.mulf %50, %204 : vector<8x32xf32>
    %206 = arith.truncf %17 : vector<16x32xf32> to vector<16x32xbf16>
    %207 = arith.truncf %203 : vector<8x32xf32> to vector<8x32xbf16>
    %cst_60 = arith.constant dense<0.000000e+00> : vector<16x8xf32>
    %208 = tpu.matmul %206, %207, %cst_60 {dimension_numbers = #tpu.dot_dimension_numbers<[1], [1], [0], [0], [0, 0, 1, 0], [], []>} : vector<16x32xbf16>, vector<8x32xbf16>, vector<16x8xf32> -> vector<16x8xf32>
    %cst_61 = arith.constant 0.353553385 : f32
    %209 = vector.broadcast %cst_61 : f32 to vector<16x8xf32>
    %210 = arith.mulf %208, %209 : vector<16x8xf32>
    %cst_62 = arith.constant -1.000000e+30 : f32
    %211 = vector.broadcast %cst_62 : f32 to vector<16x8xf32>
    %212 = arith.select %57, %210, %211 : vector<16x8xi1>, vector<16x8xf32>
    %cst_63 = arith.constant dense<0xFF800000> : vector<16xf32>
    %213 = vector.multi_reduction <maximumf>, %212, %cst_63 [1] : vector<16x8xf32> to vector<16xf32>
    %214 = vector.shape_cast %213 : vector<16xf32> to vector<16x1xf32>
    %215 = vector.broadcast %214 : vector<16x1xf32> to vector<16x8xf32>
    %216 = arith.subf %212, %215 : vector<16x8xf32>
    %217 = math.exp %216 : vector<16x8xf32>
    %cst_64 = arith.constant dense<0.000000e+00> : vector<16xf32>
    %218 = vector.multi_reduction <add>, %217, %cst_64 [1] : vector<16x8xf32> to vector<16xf32>
    %219 = vector.shape_cast %218 : vector<16xf32> to vector<16x1xf32>
    %220 = tpu.reciprocal %219 {approx = true} : vector<16x1xf32> -> vector<16x1xf32>
    %221 = vector.broadcast %220 : vector<16x1xf32> to vector<16x8xf32>
    %222 = arith.mulf %217, %221 : vector<16x8xf32>
    %223 = arith.addf %172, %201 : vector<16x32xf32>
    %224 = arith.truncf %222 : vector<16x8xf32> to vector<16x8xbf16>
    %225 = arith.truncf %205 : vector<8x32xf32> to vector<8x32xbf16>
    %cst_65 = arith.constant dense<0.000000e+00> : vector<16x32xf32>
    %226 = tpu.matmul %224, %225, %cst_65 {dimension_numbers = #tpu.dot_dimension_numbers<[1], [0], [0], [1], [0, 0, 1, 1], [], []>} : vector<16x8xbf16>, vector<8x32xbf16>, vector<16x32xf32> -> vector<16x32xf32>
    %227 = vector.broadcast %32 : f32 to vector<16x32xf32>
    %228 = arith.mulf %227, %226 : vector<16x32xf32>
    %229 = arith.addf %223, %228 : vector<16x32xf32>
    %230 = arith.addf %173, %201 : vector<16x32xf32>
    %c3_i32_66 = arith.constant 3 : i32
    %231 = vector.broadcast %c3_i32_66 : i32 to vector<1x32xi32>
    %232 = arith.cmpi eq, %22, %231 : vector<1x32xi32>
    %233 = arith.extui %232 : vector<1x32xi1> to vector<1x32xi32>
    %234 = arith.sitofp %233 : vector<1x32xi32> to vector<1x32xf32>
    %235 = vector.broadcast %234 : vector<1x32xf32> to vector<16x32xf32>
    %236 = arith.mulf %18, %235 : vector<16x32xf32>
    %237 = vector.broadcast %234 : vector<1x32xf32> to vector<16x32xf32>
    %238 = arith.mulf %19, %237 : vector<16x32xf32>
    %239 = arith.truncf %17 : vector<16x32xf32> to vector<16x32xbf16>
    %240 = arith.truncf %236 : vector<16x32xf32> to vector<16x32xbf16>
    %cst_67 = arith.constant dense<0.000000e+00> : vector<16x16xf32>
    %241 = tpu.matmul %239, %240, %cst_67 {dimension_numbers = #tpu.dot_dimension_numbers<[1], [1], [0], [0], [0, 0, 1, 0], [], []>} : vector<16x32xbf16>, vector<16x32xbf16>, vector<16x16xf32> -> vector<16x16xf32>
    %cst_68 = arith.constant 0.353553385 : f32
    %242 = vector.broadcast %cst_68 : f32 to vector<16x16xf32>
    %243 = arith.mulf %241, %242 : vector<16x16xf32>
    %cst_69 = arith.constant -1.000000e+30 : f32
    %244 = vector.broadcast %cst_69 : f32 to vector<16x16xf32>
    %245 = arith.select %31, %243, %244 : vector<16x16xi1>, vector<16x16xf32>
    %cst_70 = arith.constant dense<0xFF800000> : vector<16xf32>
    %246 = vector.multi_reduction <maximumf>, %245, %cst_70 [1] : vector<16x16xf32> to vector<16xf32>
    %247 = vector.shape_cast %246 : vector<16xf32> to vector<16x1xf32>
    %248 = vector.broadcast %247 : vector<16x1xf32> to vector<16x16xf32>
    %249 = arith.subf %245, %248 : vector<16x16xf32>
    %250 = math.exp %249 : vector<16x16xf32>
    %cst_71 = arith.constant dense<0.000000e+00> : vector<16xf32>
    %251 = vector.multi_reduction <add>, %250, %cst_71 [1] : vector<16x16xf32> to vector<16xf32>
    %252 = vector.shape_cast %251 : vector<16xf32> to vector<16x1xf32>
    %253 = tpu.reciprocal %252 {approx = true} : vector<16x1xf32> -> vector<16x1xf32>
    %254 = vector.broadcast %253 : vector<16x1xf32> to vector<16x16xf32>
    %255 = arith.mulf %250, %254 : vector<16x16xf32>
    %256 = arith.truncf %255 : vector<16x16xf32> to vector<16x16xbf16>
    %257 = arith.truncf %238 : vector<16x32xf32> to vector<16x32xbf16>
    %cst_72 = arith.constant dense<0.000000e+00> : vector<16x32xf32>
    %258 = tpu.matmul %256, %257, %cst_72 {dimension_numbers = #tpu.dot_dimension_numbers<[1], [0], [0], [1], [0, 0, 1, 1], [], []>} : vector<16x16xbf16>, vector<16x32xbf16>, vector<16x32xf32> -> vector<16x32xf32>
    %259 = vector.broadcast %234 : vector<1x32xf32> to vector<8x32xf32>
    %260 = arith.mulf %49, %259 : vector<8x32xf32>
    %261 = vector.broadcast %234 : vector<1x32xf32> to vector<8x32xf32>
    %262 = arith.mulf %50, %261 : vector<8x32xf32>
    %263 = arith.truncf %17 : vector<16x32xf32> to vector<16x32xbf16>
    %264 = arith.truncf %260 : vector<8x32xf32> to vector<8x32xbf16>
    %cst_73 = arith.constant dense<0.000000e+00> : vector<16x8xf32>
    %265 = tpu.matmul %263, %264, %cst_73 {dimension_numbers = #tpu.dot_dimension_numbers<[1], [1], [0], [0], [0, 0, 1, 0], [], []>} : vector<16x32xbf16>, vector<8x32xbf16>, vector<16x8xf32> -> vector<16x8xf32>
    %cst_74 = arith.constant 0.353553385 : f32
    %266 = vector.broadcast %cst_74 : f32 to vector<16x8xf32>
    %267 = arith.mulf %265, %266 : vector<16x8xf32>
    %cst_75 = arith.constant -1.000000e+30 : f32
    %268 = vector.broadcast %cst_75 : f32 to vector<16x8xf32>
    %269 = arith.select %57, %267, %268 : vector<16x8xi1>, vector<16x8xf32>
    %cst_76 = arith.constant dense<0xFF800000> : vector<16xf32>
    %270 = vector.multi_reduction <maximumf>, %269, %cst_76 [1] : vector<16x8xf32> to vector<16xf32>
    %271 = vector.shape_cast %270 : vector<16xf32> to vector<16x1xf32>
    %272 = vector.broadcast %271 : vector<16x1xf32> to vector<16x8xf32>
    %273 = arith.subf %269, %272 : vector<16x8xf32>
    %274 = math.exp %273 : vector<16x8xf32>
    %cst_77 = arith.constant dense<0.000000e+00> : vector<16xf32>
    %275 = vector.multi_reduction <add>, %274, %cst_77 [1] : vector<16x8xf32> to vector<16xf32>
    %276 = vector.shape_cast %275 : vector<16xf32> to vector<16x1xf32>
    %277 = tpu.reciprocal %276 {approx = true} : vector<16x1xf32> -> vector<16x1xf32>
    %278 = vector.broadcast %277 : vector<16x1xf32> to vector<16x8xf32>
    %279 = arith.mulf %274, %278 : vector<16x8xf32>
    %280 = arith.addf %229, %258 : vector<16x32xf32>
    %281 = arith.truncf %279 : vector<16x8xf32> to vector<16x8xbf16>
    %282 = arith.truncf %262 : vector<8x32xf32> to vector<8x32xbf16>
    %cst_78 = arith.constant dense<0.000000e+00> : vector<16x32xf32>
    %283 = tpu.matmul %281, %282, %cst_78 {dimension_numbers = #tpu.dot_dimension_numbers<[1], [0], [0], [1], [0, 0, 1, 1], [], []>} : vector<16x8xbf16>, vector<8x32xbf16>, vector<16x32xf32> -> vector<16x32xf32>
    %284 = vector.broadcast %32 : f32 to vector<16x32xf32>
    %285 = arith.mulf %284, %283 : vector<16x32xf32>
    %286 = arith.addf %280, %285 : vector<16x32xf32>
    %287 = arith.addf %230, %258 : vector<16x32xf32>
    %c0_79 = arith.constant 0 : index
    %c0_80 = arith.constant 0 : index
    %288 = vector.load %arg5[%c0_79, %c0_80] : memref<32x32xbf16, #tpu.memory_space<vmem>>, vector<32x32xbf16>
    %289 = arith.truncf %286 : vector<16x32xf32> to vector<16x32xbf16>
    %cst_81 = arith.constant dense<0.000000e+00> : vector<16x32xf32>
    %290 = tpu.matmul %289, %288, %cst_81 {dimension_numbers = #tpu.dot_dimension_numbers<[1], [0], [0], [1], [0, 0, 1, 1], [], []>} : vector<16x32xbf16>, vector<32x32xbf16>, vector<16x32xf32> -> vector<16x32xf32>
    %291 = arith.addf %0, %290 : vector<16x32xf32>
    %c0_82 = arith.constant 0 : index
    %c0_83 = arith.constant 0 : index
    %292 = vector.load %arg10[%c0_82, %c0_83] : memref<1x32xf32, #tpu.memory_space<vmem>>, vector<1x32xf32>
    %293 = arith.mulf %291, %291 : vector<16x32xf32>
    %cst_84 = arith.constant dense<0.000000e+00> : vector<16xf32>
    %294 = vector.multi_reduction <add>, %293, %cst_84 [1] : vector<16x32xf32> to vector<16xf32>
    %295 = vector.shape_cast %294 : vector<16xf32> to vector<16x1xf32>
    %cst_85 = arith.constant 3.200000e+01 : f32
    %296 = vector.broadcast %cst_85 : f32 to vector<16x1xf32>
    %297 = arith.divf %295, %296 : vector<16x1xf32>
    %cst_86 = arith.constant 9.99999997E-7 : f32
    %298 = vector.broadcast %cst_86 : f32 to vector<16x1xf32>
    %299 = arith.addf %297, %298 : vector<16x1xf32>
    %300 = math.rsqrt %299 : vector<16x1xf32>
    %301 = vector.broadcast %300 : vector<16x1xf32> to vector<16x32xf32>
    %302 = arith.mulf %291, %301 : vector<16x32xf32>
    %303 = vector.broadcast %292 : vector<1x32xf32> to vector<16x32xf32>
    %304 = arith.mulf %302, %303 : vector<16x32xf32>
    %c0_87 = arith.constant 0 : index
    %c0_88 = arith.constant 0 : index
    %305 = vector.load %arg6[%c0_87, %c0_88] : memref<32x128xbf16, #tpu.memory_space<vmem>>, vector<32x128xbf16>
    %306 = arith.truncf %304 : vector<16x32xf32> to vector<16x32xbf16>
    %cst_89 = arith.constant dense<0.000000e+00> : vector<16x128xf32>
    %307 = tpu.matmul %306, %305, %cst_89 {dimension_numbers = #tpu.dot_dimension_numbers<[1], [0], [0], [1], [0, 0, 1, 1], [], []>} : vector<16x32xbf16>, vector<32x128xbf16>, vector<16x128xf32> -> vector<16x128xf32>
    %308 = vector.extract_strided_slice %307 {offsets = [0, 0], sizes = [16, 64], strides = [1, 1]} : vector<16x128xf32> to vector<16x64xf32>
    %309 = vector.extract_strided_slice %307 {offsets = [0, 64], sizes = [16, 64], strides = [1, 1]} : vector<16x128xf32> to vector<16x64xf32>
    %cst_90 = arith.constant 0.000000e+00 : f32
    %310 = vector.broadcast %cst_90 : f32 to vector<16x64xf32>
    %311 = arith.subf %310, %308 : vector<16x64xf32>
    %312 = math.exp %311 : vector<16x64xf32>
    %cst_91 = arith.constant 1.000000e+00 : f32
    %313 = vector.broadcast %cst_91 : f32 to vector<16x64xf32>
    %314 = arith.addf %313, %312 : vector<16x64xf32>
    %315 = tpu.reciprocal %314 {approx = true} : vector<16x64xf32> -> vector<16x64xf32>
    %316 = arith.mulf %308, %315 : vector<16x64xf32>
    %317 = arith.mulf %316, %309 : vector<16x64xf32>
    %c0_92 = arith.constant 0 : index
    %c0_93 = arith.constant 0 : index
    %318 = vector.load %arg7[%c0_92, %c0_93] : memref<64x32xbf16, #tpu.memory_space<vmem>>, vector<64x32xbf16>
    %319 = arith.truncf %317 : vector<16x64xf32> to vector<16x64xbf16>
    %cst_94 = arith.constant dense<0.000000e+00> : vector<16x32xf32>
    %320 = tpu.matmul %319, %318, %cst_94 {dimension_numbers = #tpu.dot_dimension_numbers<[1], [0], [0], [1], [0, 0, 1, 1], [], []>} : vector<16x64xbf16>, vector<64x32xbf16>, vector<16x32xf32> -> vector<16x32xf32>
    %321 = arith.addf %291, %320 : vector<16x32xf32>
    %c0_95 = arith.constant 0 : index
    %c0_96 = arith.constant 0 : index
    %322 = vector.load %arg11[%c0_95, %c0_96] : memref<1x32xf32, #tpu.memory_space<vmem>>, vector<1x32xf32>
    %323 = arith.mulf %321, %321 : vector<16x32xf32>
    %cst_97 = arith.constant dense<0.000000e+00> : vector<16xf32>
    %324 = vector.multi_reduction <add>, %323, %cst_97 [1] : vector<16x32xf32> to vector<16xf32>
    %325 = vector.shape_cast %324 : vector<16xf32> to vector<16x1xf32>
    %cst_98 = arith.constant 3.200000e+01 : f32
    %326 = vector.broadcast %cst_98 : f32 to vector<16x1xf32>
    %327 = arith.divf %325, %326 : vector<16x1xf32>
    %cst_99 = arith.constant 9.99999997E-7 : f32
    %328 = vector.broadcast %cst_99 : f32 to vector<16x1xf32>
    %329 = arith.addf %327, %328 : vector<16x1xf32>
    %330 = math.rsqrt %329 : vector<16x1xf32>
    %331 = vector.broadcast %330 : vector<16x1xf32> to vector<16x32xf32>
    %332 = arith.mulf %321, %331 : vector<16x32xf32>
    %333 = vector.broadcast %322 : vector<1x32xf32> to vector<16x32xf32>
    %334 = arith.mulf %332, %333 : vector<16x32xf32>
    %c0_100 = arith.constant 0 : index
    %c0_101 = arith.constant 0 : index
    %335 = vector.load %arg8[%c0_100, %c0_101] : memref<32x128xbf16, #tpu.memory_space<vmem>>, vector<32x128xbf16>
    %336 = arith.truncf %334 : vector<16x32xf32> to vector<16x32xbf16>
    %cst_102 = arith.constant dense<0.000000e+00> : vector<16x128xf32>
    %337 = tpu.matmul %336, %335, %cst_102 {dimension_numbers = #tpu.dot_dimension_numbers<[1], [0], [0], [1], [0, 0, 1, 1], [], []>} : vector<16x32xbf16>, vector<32x128xbf16>, vector<16x128xf32> -> vector<16x128xf32>
    %c0_103 = arith.constant 0 : index
    %c0_104 = arith.constant 0 : index
    %338 = vector.load %arg14[%c0_103, %c0_104] : memref<16x128xf32, #tpu.memory_space<vmem>>, vector<16x128xf32>
    tpu.vector_store %arg14[%c0_103, %c0_104], %337 {strides = array<i32>} : memref<16x128xf32, #tpu.memory_space<vmem>>, vector<16x128xf32>,
    %c0_105 = arith.constant 0 : index
    %c0_106 = arith.constant 0 : index
    %339 = vector.load %arg5[%c0_105, %c0_106] : memref<32x32xbf16, #tpu.memory_space<vmem>>, vector<32x32xbf16>
    %340 = arith.truncf %287 : vector<16x32xf32> to vector<16x32xbf16>
    %cst_107 = arith.constant dense<0.000000e+00> : vector<16x32xf32>
    %341 = tpu.matmul %340, %339, %cst_107 {dimension_numbers = #tpu.dot_dimension_numbers<[1], [0], [0], [1], [0, 0, 1, 1], [], []>} : vector<16x32xbf16>, vector<32x32xbf16>, vector<16x32xf32> -> vector<16x32xf32>
    %342 = arith.addf %0, %341 : vector<16x32xf32>
    %c0_108 = arith.constant 0 : index
    %c0_109 = arith.constant 0 : index
    %343 = vector.load %arg10[%c0_108, %c0_109] : memref<1x32xf32, #tpu.memory_space<vmem>>, vector<1x32xf32>
    %344 = arith.mulf %342, %342 : vector<16x32xf32>
    %cst_110 = arith.constant dense<0.000000e+00> : vector<16xf32>
    %345 = vector.multi_reduction <add>, %344, %cst_110 [1] : vector<16x32xf32> to vector<16xf32>
    %346 = vector.shape_cast %345 : vector<16xf32> to vector<16x1xf32>
    %cst_111 = arith.constant 3.200000e+01 : f32
    %347 = vector.broadcast %cst_111 : f32 to vector<16x1xf32>
    %348 = arith.divf %346, %347 : vector<16x1xf32>
    %cst_112 = arith.constant 9.99999997E-7 : f32
    %349 = vector.broadcast %cst_112 : f32 to vector<16x1xf32>
    %350 = arith.addf %348, %349 : vector<16x1xf32>
    %351 = math.rsqrt %350 : vector<16x1xf32>
    %352 = vector.broadcast %351 : vector<16x1xf32> to vector<16x32xf32>
    %353 = arith.mulf %342, %352 : vector<16x32xf32>
    %354 = vector.broadcast %343 : vector<1x32xf32> to vector<16x32xf32>
    %355 = arith.mulf %353, %354 : vector<16x32xf32>
    %c0_113 = arith.constant 0 : index
    %c0_114 = arith.constant 0 : index
    %356 = vector.load %arg6[%c0_113, %c0_114] : memref<32x128xbf16, #tpu.memory_space<vmem>>, vector<32x128xbf16>
    %357 = arith.truncf %355 : vector<16x32xf32> to vector<16x32xbf16>
    %cst_115 = arith.constant dense<0.000000e+00> : vector<16x128xf32>
    %358 = tpu.matmul %357, %356, %cst_115 {dimension_numbers = #tpu.dot_dimension_numbers<[1], [0], [0], [1], [0, 0, 1, 1], [], []>} : vector<16x32xbf16>, vector<32x128xbf16>, vector<16x128xf32> -> vector<16x128xf32>
    %359 = vector.extract_strided_slice %358 {offsets = [0, 0], sizes = [16, 64], strides = [1, 1]} : vector<16x128xf32> to vector<16x64xf32>
    %360 = vector.extract_strided_slice %358 {offsets = [0, 64], sizes = [16, 64], strides = [1, 1]} : vector<16x128xf32> to vector<16x64xf32>
    %cst_116 = arith.constant 0.000000e+00 : f32
    %361 = vector.broadcast %cst_116 : f32 to vector<16x64xf32>
    %362 = arith.subf %361, %359 : vector<16x64xf32>
    %363 = math.exp %362 : vector<16x64xf32>
    %cst_117 = arith.constant 1.000000e+00 : f32
    %364 = vector.broadcast %cst_117 : f32 to vector<16x64xf32>
    %365 = arith.addf %364, %363 : vector<16x64xf32>
    %366 = tpu.reciprocal %365 {approx = true} : vector<16x64xf32> -> vector<16x64xf32>
    %367 = arith.mulf %359, %366 : vector<16x64xf32>
    %368 = arith.mulf %367, %360 : vector<16x64xf32>
    %c0_118 = arith.constant 0 : index
    %c0_119 = arith.constant 0 : index
    %369 = vector.load %arg7[%c0_118, %c0_119] : memref<64x32xbf16, #tpu.memory_space<vmem>>, vector<64x32xbf16>
    %370 = arith.truncf %368 : vector<16x64xf32> to vector<16x64xbf16>
    %cst_120 = arith.constant dense<0.000000e+00> : vector<16x32xf32>
    %371 = tpu.matmul %370, %369, %cst_120 {dimension_numbers = #tpu.dot_dimension_numbers<[1], [0], [0], [1], [0, 0, 1, 1], [], []>} : vector<16x64xbf16>, vector<64x32xbf16>, vector<16x32xf32> -> vector<16x32xf32>
    %372 = arith.addf %342, %371 : vector<16x32xf32>
    %c0_121 = arith.constant 0 : index
    %c0_122 = arith.constant 0 : index
    %373 = vector.load %arg11[%c0_121, %c0_122] : memref<1x32xf32, #tpu.memory_space<vmem>>, vector<1x32xf32>
    %374 = arith.mulf %372, %372 : vector<16x32xf32>
    %cst_123 = arith.constant dense<0.000000e+00> : vector<16xf32>
    %375 = vector.multi_reduction <add>, %374, %cst_123 [1] : vector<16x32xf32> to vector<16xf32>
    %376 = vector.shape_cast %375 : vector<16xf32> to vector<16x1xf32>
    %cst_124 = arith.constant 3.200000e+01 : f32
    %377 = vector.broadcast %cst_124 : f32 to vector<16x1xf32>
    %378 = arith.divf %376, %377 : vector<16x1xf32>
    %cst_125 = arith.constant 9.99999997E-7 : f32
    %379 = vector.broadcast %cst_125 : f32 to vector<16x1xf32>
    %380 = arith.addf %378, %379 : vector<16x1xf32>
    %381 = math.rsqrt %380 : vector<16x1xf32>
    %382 = vector.broadcast %381 : vector<16x1xf32> to vector<16x32xf32>
    %383 = arith.mulf %372, %382 : vector<16x32xf32>
    %384 = vector.broadcast %373 : vector<1x32xf32> to vector<16x32xf32>
    %385 = arith.mulf %383, %384 : vector<16x32xf32>
    %c0_126 = arith.constant 0 : index
    %c0_127 = arith.constant 0 : index
    %386 = vector.load %arg8[%c0_126, %c0_127] : memref<32x128xbf16, #tpu.memory_space<vmem>>, vector<32x128xbf16>
    %387 = arith.truncf %385 : vector<16x32xf32> to vector<16x32xbf16>
    %cst_128 = arith.constant dense<0.000000e+00> : vector<16x128xf32>
    %388 = tpu.matmul %387, %386, %cst_128 {dimension_numbers = #tpu.dot_dimension_numbers<[1], [0], [0], [1], [0, 0, 1, 1], [], []>} : vector<16x32xbf16>, vector<32x128xbf16>, vector<16x128xf32> -> vector<16x128xf32>
    %389 = arith.truncf %388 : vector<16x128xf32> to vector<16x128xbf16>
    %c0_129 = arith.constant 0 : index
    %c0_130 = arith.constant 0 : index
    %390 = vector.load %arg15[%c0_129, %c0_130] : memref<16x128xbf16, #tpu.memory_space<vmem>>, vector<16x128xbf16>
    tpu.vector_store %arg15[%c0_129, %c0_130], %389 {strides = array<i32>} : memref<16x128xbf16, #tpu.memory_space<vmem>>, vector<16x128xbf16>,
    %391 = tpu.iota {dimensions = array<i32: 1>} : vector<16x128xi32>
    %392 = tpu.iota {dimensions = array<i32: 0>} : vector<16x1xi32>
    %c-100_i32 = arith.constant -100 : i32
    %393 = vector.broadcast %c-100_i32 : i32 to vector<16x1xi32>
    %c0_i32_131 = arith.constant 0 : i32
    %394 = vector.broadcast %c0_i32_131 : i32 to vector<16x1xi32>
    %395 = arith.cmpi eq, %392, %394 : vector<16x1xi32>
    %c0_132 = arith.constant 0 : index
    %396 = memref.load %arg13[%c0_132] : memref<16xi32, #tpu.memory_space<smem>>
    %397 = vector.broadcast %396 : i32 to vector<16x1xi32>
    %398 = arith.select %395, %397, %393 : vector<16x1xi1>, vector<16x1xi32>
    %c1_i32_133 = arith.constant 1 : i32
    %399 = vector.broadcast %c1_i32_133 : i32 to vector<16x1xi32>
    %400 = arith.cmpi eq, %392, %399 : vector<16x1xi32>
    %c1 = arith.constant 1 : index
    %401 = memref.load %arg13[%c1] : memref<16xi32, #tpu.memory_space<smem>>
    %402 = vector.broadcast %401 : i32 to vector<16x1xi32>
    %403 = arith.select %400, %402, %398 : vector<16x1xi1>, vector<16x1xi32>
    %c2_i32_134 = arith.constant 2 : i32
    %404 = vector.broadcast %c2_i32_134 : i32 to vector<16x1xi32>
    %405 = arith.cmpi eq, %392, %404 : vector<16x1xi32>
    %c2_135 = arith.constant 2 : index
    %406 = memref.load %arg13[%c2_135] : memref<16xi32, #tpu.memory_space<smem>>
    %407 = vector.broadcast %406 : i32 to vector<16x1xi32>
    %408 = arith.select %405, %407, %403 : vector<16x1xi1>, vector<16x1xi32>
    %c3_i32_136 = arith.constant 3 : i32
    %409 = vector.broadcast %c3_i32_136 : i32 to vector<16x1xi32>
    %410 = arith.cmpi eq, %392, %409 : vector<16x1xi32>
    %c3 = arith.constant 3 : index
    %411 = memref.load %arg13[%c3] : memref<16xi32, #tpu.memory_space<smem>>
    %412 = vector.broadcast %411 : i32 to vector<16x1xi32>
    %413 = arith.select %410, %412, %408 : vector<16x1xi1>, vector<16x1xi32>
    %c4_i32 = arith.constant 4 : i32
    %414 = vector.broadcast %c4_i32 : i32 to vector<16x1xi32>
    %415 = arith.cmpi eq, %392, %414 : vector<16x1xi32>
    %c4_137 = arith.constant 4 : index
    %416 = memref.load %arg13[%c4_137] : memref<16xi32, #tpu.memory_space<smem>>
    %417 = vector.broadcast %416 : i32 to vector<16x1xi32>
    %418 = arith.select %415, %417, %413 : vector<16x1xi1>, vector<16x1xi32>
    %c5_i32 = arith.constant 5 : i32
    %419 = vector.broadcast %c5_i32 : i32 to vector<16x1xi32>
    %420 = arith.cmpi eq, %392, %419 : vector<16x1xi32>
    %c5 = arith.constant 5 : index
    %421 = memref.load %arg13[%c5] : memref<16xi32, #tpu.memory_space<smem>>
    %422 = vector.broadcast %421 : i32 to vector<16x1xi32>
    %423 = arith.select %420, %422, %418 : vector<16x1xi1>, vector<16x1xi32>
    %c6_i32 = arith.constant 6 : i32
    %424 = vector.broadcast %c6_i32 : i32 to vector<16x1xi32>
    %425 = arith.cmpi eq, %392, %424 : vector<16x1xi32>
    %c6_138 = arith.constant 6 : index
    %426 = memref.load %arg13[%c6_138] : memref<16xi32, #tpu.memory_space<smem>>
    %427 = vector.broadcast %426 : i32 to vector<16x1xi32>
    %428 = arith.select %425, %427, %423 : vector<16x1xi1>, vector<16x1xi32>
    %c7_i32 = arith.constant 7 : i32
    %429 = vector.broadcast %c7_i32 : i32 to vector<16x1xi32>
    %430 = arith.cmpi eq, %392, %429 : vector<16x1xi32>
    %c7 = arith.constant 7 : index
    %431 = memref.load %arg13[%c7] : memref<16xi32, #tpu.memory_space<smem>>
    %432 = vector.broadcast %431 : i32 to vector<16x1xi32>
    %433 = arith.select %430, %432, %428 : vector<16x1xi1>, vector<16x1xi32>
    %c8_i32 = arith.constant 8 : i32
    %434 = vector.broadcast %c8_i32 : i32 to vector<16x1xi32>
    %435 = arith.cmpi eq, %392, %434 : vector<16x1xi32>
    %c8 = arith.constant 8 : index
    %436 = memref.load %arg13[%c8] : memref<16xi32, #tpu.memory_space<smem>>
    %437 = vector.broadcast %436 : i32 to vector<16x1xi32>
    %438 = arith.select %435, %437, %433 : vector<16x1xi1>, vector<16x1xi32>
    %c9_i32 = arith.constant 9 : i32
    %439 = vector.broadcast %c9_i32 : i32 to vector<16x1xi32>
    %440 = arith.cmpi eq, %392, %439 : vector<16x1xi32>
    %c9 = arith.constant 9 : index
    %441 = memref.load %arg13[%c9] : memref<16xi32, #tpu.memory_space<smem>>
    %442 = vector.broadcast %441 : i32 to vector<16x1xi32>
    %443 = arith.select %440, %442, %438 : vector<16x1xi1>, vector<16x1xi32>
    %c10_i32 = arith.constant 10 : i32
    %444 = vector.broadcast %c10_i32 : i32 to vector<16x1xi32>
    %445 = arith.cmpi eq, %392, %444 : vector<16x1xi32>
    %c10 = arith.constant 10 : index
    %446 = memref.load %arg13[%c10] : memref<16xi32, #tpu.memory_space<smem>>
    %447 = vector.broadcast %446 : i32 to vector<16x1xi32>
    %448 = arith.select %445, %447, %443 : vector<16x1xi1>, vector<16x1xi32>
    %c11_i32 = arith.constant 11 : i32
    %449 = vector.broadcast %c11_i32 : i32 to vector<16x1xi32>
    %450 = arith.cmpi eq, %392, %449 : vector<16x1xi32>
    %c11 = arith.constant 11 : index
    %451 = memref.load %arg13[%c11] : memref<16xi32, #tpu.memory_space<smem>>
    %452 = vector.broadcast %451 : i32 to vector<16x1xi32>
    %453 = arith.select %450, %452, %448 : vector<16x1xi1>, vector<16x1xi32>
    %c12_i32 = arith.constant 12 : i32
    %454 = vector.broadcast %c12_i32 : i32 to vector<16x1xi32>
    %455 = arith.cmpi eq, %392, %454 : vector<16x1xi32>
    %c12 = arith.constant 12 : index
    %456 = memref.load %arg13[%c12] : memref<16xi32, #tpu.memory_space<smem>>
    %457 = vector.broadcast %456 : i32 to vector<16x1xi32>
    %458 = arith.select %455, %457, %453 : vector<16x1xi1>, vector<16x1xi32>
    %c13_i32 = arith.constant 13 : i32
    %459 = vector.broadcast %c13_i32 : i32 to vector<16x1xi32>
    %460 = arith.cmpi eq, %392, %459 : vector<16x1xi32>
    %c13 = arith.constant 13 : index
    %461 = memref.load %arg13[%c13] : memref<16xi32, #tpu.memory_space<smem>>
    %462 = vector.broadcast %461 : i32 to vector<16x1xi32>
    %463 = arith.select %460, %462, %458 : vector<16x1xi1>, vector<16x1xi32>
    %c14_i32 = arith.constant 14 : i32
    %464 = vector.broadcast %c14_i32 : i32 to vector<16x1xi32>
    %465 = arith.cmpi eq, %392, %464 : vector<16x1xi32>
    %c14 = arith.constant 14 : index
    %466 = memref.load %arg13[%c14] : memref<16xi32, #tpu.memory_space<smem>>
    %467 = vector.broadcast %466 : i32 to vector<16x1xi32>
    %468 = arith.select %465, %467, %463 : vector<16x1xi1>, vector<16x1xi32>
    %c15_i32 = arith.constant 15 : i32
    %469 = vector.broadcast %c15_i32 : i32 to vector<16x1xi32>
    %470 = arith.cmpi eq, %392, %469 : vector<16x1xi32>
    %c15 = arith.constant 15 : index
    %471 = memref.load %arg13[%c15] : memref<16xi32, #tpu.memory_space<smem>>
    %472 = vector.broadcast %471 : i32 to vector<16x1xi32>
    %473 = arith.select %470, %472, %468 : vector<16x1xi1>, vector<16x1xi32>
    %cst_139 = arith.constant dense<0xFF800000> : vector<16xf32>
    %474 = vector.multi_reduction <maximumf>, %337, %cst_139 [1] : vector<16x128xf32> to vector<16xf32>
    %475 = vector.shape_cast %474 : vector<16xf32> to vector<16x1xf32>
    %476 = vector.broadcast %475 : vector<16x1xf32> to vector<16x128xf32>
    %477 = arith.subf %337, %476 : vector<16x128xf32>
    %478 = math.exp %477 : vector<16x128xf32>
    %cst_140 = arith.constant dense<0.000000e+00> : vector<16xf32>
    %479 = vector.multi_reduction <add>, %478, %cst_140 [1] : vector<16x128xf32> to vector<16xf32>
    %480 = vector.shape_cast %479 : vector<16xf32> to vector<16x1xf32>
    %481 = math.log %480 : vector<16x1xf32>
    %482 = arith.addf %475, %481 : vector<16x1xf32>
    %483 = vector.broadcast %473 : vector<16x1xi32> to vector<16x128xi32>
    %484 = arith.cmpi eq, %391, %483 : vector<16x128xi32>
    %cst_141 = arith.constant 0.000000e+00 : f32
    %485 = vector.broadcast %cst_141 : f32 to vector<16x128xf32>
    %486 = arith.select %484, %337, %485 : vector<16x128xi1>, vector<16x128xf32>
    %cst_142 = arith.constant dense<0.000000e+00> : vector<16xf32>
    %487 = vector.multi_reduction <add>, %486, %cst_142 [1] : vector<16x128xf32> to vector<16xf32>
    %488 = vector.shape_cast %487 : vector<16xf32> to vector<16x1xf32>
    %c0_i32_143 = arith.constant 0 : i32
    %489 = vector.broadcast %c0_i32_143 : i32 to vector<16x1xi32>
    %490 = arith.cmpi sge, %473, %489 : vector<16x1xi32>
    %491 = arith.extui %490 : vector<16x1xi1> to vector<16x1xi32>
    %492 = arith.sitofp %491 : vector<16x1xi32> to vector<16x1xf32>
    %493 = arith.subf %482, %488 : vector<16x1xf32>
    %494 = arith.mulf %493, %492 : vector<16x1xf32>
    %495 = vector.shape_cast %494 : vector<16x1xf32> to vector<1x16x1xf32>
    %cst_144 = arith.constant dense<0.000000e+00> : vector<1xf32>
    %496 = vector.multi_reduction <add>, %495, %cst_144 [1, 2] : vector<1x16x1xf32> to vector<1xf32>
    %497 = vector.shape_cast %496 : vector<1xf32> to vector<1x1x1xf32>
    %498 = vector.extract %497[0, 0, 0] : f32 from vector<1x1x1xf32>
    %499 = vector.broadcast %498 : f32 to vector<1x1xf32>
    %500 = vector.shape_cast %492 : vector<16x1xf32> to vector<1x16x1xf32>
    %cst_145 = arith.constant dense<0.000000e+00> : vector<1xf32>
    %501 = vector.multi_reduction <add>, %500, %cst_145 [1, 2] : vector<1x16x1xf32> to vector<1xf32>
    %502 = vector.shape_cast %501 : vector<1xf32> to vector<1x1x1xf32>
    %503 = vector.extract %502[0, 0, 0] : f32 from vector<1x1x1xf32>
    %504 = vector.broadcast %503 : f32 to vector<1x1xf32>
    %505 = arith.divf %499, %504 : vector<1x1xf32>
    %c0_146 = arith.constant 0 : index
    %c0_147 = arith.constant 0 : index
    %506 = vector.load %arg16[%c0_146, %c0_147] : memref<1x1xf32, #tpu.memory_space<vmem>>, vector<1x1xf32>
    tpu.vector_store %arg16[%c0_146, %c0_147], %505 {strides = array<i32>} : memref<1x1xf32, #tpu.memory_space<vmem>>, vector<1x1xf32>,
    return
  }
  func.func @transform_0(%arg0: i32) -> (i32, i32) {
    %c0_i32 = arith.constant 0 : i32
    %c0_i32_0 = arith.constant 0 : i32
    %c0_i32_1 = arith.constant 0 : i32
    return %c0_i32, %c0_i32_0 : i32, i32
  }
  func.func @transform_1(%arg0: i32) -> (i32, i32) {
    %c0_i32 = arith.constant 0 : i32
    %c0_i32_0 = arith.constant 0 : i32
    %c0_i32_1 = arith.constant 0 : i32
    return %c0_i32, %c0_i32_0 : i32, i32
  }
  func.func @transform_2(%arg0: i32) -> (i32, i32) {
    %c0_i32 = arith.constant 0 : i32
    %c0_i32_0 = arith.constant 0 : i32
    %c0_i32_1 = arith.constant 0 : i32
    return %c0_i32, %c0_i32_0 : i32, i32
  }
  func.func @transform_3(%arg0: i32) -> (i32, i32) {
    %c0_i32 = arith.constant 0 : i32
    %c0_i32_0 = arith.constant 0 : i32
    %c0_i32_1 = arith.constant 0 : i32
    return %c0_i32, %c0_i32_0 : i32, i32
  }
  func.func @transform_4(%arg0: i32) -> (i32, i32) {
    %c0_i32 = arith.constant 0 : i32
    %c0_i32_0 = arith.constant 0 : i32
    %c0_i32_1 = arith.constant 0 : i32
    return %c0_i32, %c0_i32_0 : i32, i32
  }
  func.func @transform_5(%arg0: i32) -> (i32, i32) {
    %c0_i32 = arith.constant 0 : i32
    %c0_i32_0 = arith.constant 0 : i32
    %c0_i32_1 = arith.constant 0 : i32
    return %c0_i32, %c0_i32_0 : i32, i32
  }
  func.func @transform_6(%arg0: i32) -> (i32, i32) {
    %c0_i32 = arith.constant 0 : i32
    %c0_i32_0 = arith.constant 0 : i32
    %c0_i32_1 = arith.constant 0 : i32
    return %c0_i32, %c0_i32_0 : i32, i32
  }
  func.func @transform_7(%arg0: i32) -> (i32, i32) {
    %c0_i32 = arith.constant 0 : i32
    %c0_i32_0 = arith.constant 0 : i32
    %c0_i32_1 = arith.constant 0 : i32
    return %c0_i32, %c0_i32_0 : i32, i32
  }
  func.func @transform_8(%arg0: i32) -> (i32, i32) {
    %c0_i32 = arith.constant 0 : i32
    %c0_i32_0 = arith.constant 0 : i32
    %c0_i32_1 = arith.constant 0 : i32
    return %c0_i32, %c0_i32_0 : i32, i32
  }
  func.func @transform_9(%arg0: i32) -> (i32, i32) {
    %c0_i32 = arith.constant 0 : i32
    %c0_i32_0 = arith.constant 0 : i32
    %c0_i32_1 = arith.constant 0 : i32
    return %c0_i32, %c0_i32_0 : i32, i32
  }
  func.func @transform_10(%arg0: i32) -> (i32, i32) {
    %c0_i32 = arith.constant 0 : i32
    %c0_i32_0 = arith.constant 0 : i32
    %c0_i32_1 = arith.constant 0 : i32
    return %c0_i32, %c0_i32_0 : i32, i32
  }
  func.func @transform_11(%arg0: i32) -> i32 {
    %c0_i32 = arith.constant 0 : i32
    %c0_i32_0 = arith.constant 0 : i32
    return %c0_i32 : i32
  }
  func.func @transform_12(%arg0: i32) -> i32 {
    %c0_i32 = arith.constant 0 : i32
    %c0_i32_0 = arith.constant 0 : i32
    return %c0_i32 : i32
  }
  func.func @transform_13(%arg0: i32) -> (i32, i32) {
    %c0_i32 = arith.constant 0 : i32
    %c0_i32_0 = arith.constant 0 : i32
    %c0_i32_1 = arith.constant 0 : i32
    return %c0_i32, %c0_i32_0 : i32, i32
  }
  func.func @transform_14(%arg0: i32) -> (i32, i32) {
    %c0_i32 = arith.constant 0 : i32
    %c0_i32_0 = arith.constant 0 : i32
    %c0_i32_1 = arith.constant 0 : i32
    return %c0_i32, %c0_i32_0 : i32, i32
  }
  func.func @transform_15(%arg0: i32) -> (i32, i32) {
    %c0_i32 = arith.constant 0 : i32
    %c0_i32_0 = arith.constant 0 : i32
    %c0_i32_1 = arith.constant 0 : i32
    return %c0_i32, %c0_i32_0 : i32, i32
  }
}

</mosaic_0001>

<bundles_post_ra>
// kernel: enc_tuned_lm_forward.1
= control target key start
LH: loop header
LB: loop body
LE: loop exit
PB: predicated region body
PF: predicated region fallthrough
CT: control target
= control target key end

     0   :  { %22 = vsyncpa [#allocation6], 0  ;;  %s3711_s0 = inlined_call_operand.vmem [shape: f32[16,32], index: 0, kind: input, shape index: {}]   ;;  %s3712_s1 = inlined_call_operand.vmem [shape: f32[2,16], index: 1, kind: input, shape index: {}]   ;;  %s3713_s2 = inlined_call_operand.vmem [shape: bf16[16,128], index: 2, kind: input, shape index: {}]   ;;  %s3714_s3 = inlined_call_operand.vmem [shape: bf16[32,96], index: 3, kind: input, shape index: {}]   ;;  %s3715_s4 = inlined_call_operand.vmem [shape: bf16[32,32], index: 4, kind: input, shape index: {}]   ;;  %s3716_s5 = inlined_call_operand.vmem [shape: bf16[32,128], index: 5, kind: input, shape index: {}]   ;;  %s3717_s6 = inlined_call_operand.vmem [shape: bf16[64,32], index: 6, kind: input, shape index: {}]   ;;  %s3718_s7 = inlined_call_operand.vmem [shape: bf16[32,128], index: 7, kind: input, shape index: {}]   ;;  %s3719_s8 = inlined_call_operand.vmem [shape: f32[1,32], index: 8, kind: input, shape index: {}]   ;;  %s3720_s9 = inlined_call_operand.vmem [shape: f32[1,32], index: 9, kind: input, shape index: {}]   ;;  %s3721_s10 = inlined_call_operand.vmem [shape: f32[1,32], index: 10, kind: input, shape index: {}]   ;;  %s3722_s11 = inlined_call_operand.<no memory space> [shape: f32[1], index: 11, kind: input, shape index: {}]   ;;  %s3723_s12 = inlined_call_operand.vmem [shape: s32[16], index: 12, kind: input, shape index: {}]   ;;  %s3724_s13 = inlined_call_operand.hbm [shape: f32[16,128], index: 13, kind: output, shape index: {0}]   ;;  %s3725_s14 = inlined_call_operand.hbm [shape: bf16[16,128], index: 14, kind: output, shape index: {1}]   ;;  %s3726_s15 = inlined_call_operand.hbm [shape: f32[1,1], index: 15, kind: output, shape index: {2}]  }
   0x1   :  { %23 = vsyncpa [#allocation5], 0 }
   0x2   :  { %24 = vsyncpa [#allocation9], 0  ;;  %s55_s20 = sshll.u32 %s3723_s12, 4  ;;  %s56_s20 = int_to_ptr.vmem [resolvable:$true] %s55_s20 }
   0x3   :  { %s2800_s21 = scalar_lea.vmem %s56_s20, 16  ;;  %p2805_p1 = scmp.lt.s32.totalorder %s56_s20, %s56_s20 }
   0x4   :  { %p2801_p0 = scmp.ne.s32.totalorder %s56_s20, %s2800_s21  ;;  %p2806_p2 = scmp.lt.s32.totalorder %s2800_s21, %s2800_s21 }
   0x6   :  { %p2807_p3 = por %p2806_p2, %p2805_p1 }
   0x8   :  { %p2808_p4 = pnand %p2807_p3, %p2801_p0 }
   0xa   :  { %2811 = shalt.err (!%p2808_p4)
}
   0xb   :  { %s2878_s22 = smov [#allocation4]  }
   0xc   :  { %58 = dma.vmem_to_smem %s56_s20, 16, %s2878_s22, [#allocation6]  }
   0xd   :  { %2872 = dma.done.wait [#allocation6], 16  }
   0xe   :  { %2873 = vsyncadd [#allocation6], 4294967280 }
   0xf   :  { %62 = sfence }
  0x10   :  { %v64_v0 = vld [vmem:[%s3711_s0] sm:$0xff]  ;;  %vm69_vm0 = vcmask 261120   ;;  %v65_v1 = vld [vmem:[%s3711_s0 + $0x8] sm:$0xff]  ;;  %v2879_v7 = vmov 0.0   ;;  %vm2880_vm1 = vmmov 0   ;;  %v154_v11 = vlaneseq  ;;  %s2882_s20 = smov 96  }
  0x11   :  { %v67_v2 = vmul.f32 %v64_v0, %v64_v0  ;;  %v68_v3 = vmul.f32 %v65_v1, %v65_v1  ;;  %v2663_v6 = vld [vmem:[%s3714_s3 + $0x8] sm:$0xff]   ;;  %2452 = vmatprep.subr.bf16.mxu0 %v2879_v7  ;;  %2456 = vmatprep.mubr.msk.bf16.mxu0 %vm2880_vm1, %v2879_v7  ;;  %v2664_v8 = vld [vmem:[%s3714_s3] sm:$0xff]   ;;  %vm179_vm2 = vcmask 130048   ;;  %vm223_vm4 = vcmask 254976   ;;  %s2883_s24 = smov 64   ;;  %s2360_s23 = sld [smem:[#allocation4 + $0x1]] }
  0x12   :  { %2453 = vmatpush3.bf16.msra.mxu0 %v2663_v6  ;;  %2460 = vmatprep.subr.bf16.mxu1 %v2879_v7  ;;  %v2665_v9 = vld [vmem:[%s3713_s2] sm:$0xff]   ;;  %v3002_v13 = vand.u32 127, %v154_v11  ;;  %v2666_v39 = vld [vmem:[%s3714_s3 + $0x8] sm:$0xff]   ;;  %v3063_v52 = vshrl.u32 %v154_v11, 7  ;;  %vm450_vm15 = vcmask 64512   ;;  %s2361_s25 = sld [smem:[#allocation4 + $0x2]] }
  0x13   :  { %v70_v4 = vsel %vm69_vm0, %v67_v2, 0.0  ;;  %v73_v5 = vsel %vm69_vm0, %v68_v3, 0.0  ;;  %2454 = vmatprep.subr.bf16.mxu0 %v2879_v7  ;;  %2462 = vmatprep.mubr.msk.bf16.mxu1 %vm2880_vm1, %v2879_v7  ;;  %v169_v10 = vld [vmem:[%s3712_s1] sm:$0x3]  ;;  %s2881_s1 = smov 32   ;;  %s2368_s12 = sld [smem:[#allocation4 + $0x9]] }
  0x14   :  { %71 = vadd.xlane.f32.xlu0 %v70_v4  ;;  %v172_v12 = vpack.c.bf16 %v169_v10, %v169_v10  ;;  %2461 = vmatpush3.bf16.msra.mxu1 %v2665_v9  ;;  %v3006_v14 = vshra.s32 %v3002_v13, 3  ;;  %v2297_v25 = vld [vmem:[%s3719_s8] ss:$0 sm:$0xff]  ;;  %v160_v53 = vshra.s32 %v3063_v52, 3  ;;  %v3067_v54 = vadd.s32 8, %v3063_v52  ;;  %s2362_s26 = sld [smem:[#allocation4 + $0x3]] }
  0x15   :  { %2466 = vmatprep.subr.bf16.mxu1 %v2879_v7  ;;  %v2667_v43 = vld [vmem:[%s3714_s3] sm:$0xff]   ;;  %vm164_vm6 = vcmp.le.s32.totalorder %v3002_v13, %v3063_v52  ;;  %s2367_s3 = sld [smem:[#allocation4 + $0x8]] }
  0x16   :  { %2455 = vmatpush3.bf16.msra.mxu0 %v2664_v8  ;;  %vm302_vm3 = vcmp.eq.s32.totalorder %v3006_v14, 0  ;;  %vm162_vm5 = vcmp.eq.s32.totalorder %v160_v53, %v3006_v14  ;;  %v161_v55 = vshra.s32 %v3067_v54, 3  ;;  %vm165_vm9 = vcmp.le.s32.totalorder %v3002_v13, %v3067_v54  ;;  %s3619_s27 = sld [smem:[#allocation4 + $0xa]] }
  0x17   :  { %2474 = vmatprep.subr.bf16.mxu0 %v2879_v7  ;;  %2463 = vmatmul.mubr.msk.bf16.vlgmr.msra.gmra.mxu1 %vm179_vm2, %v172_v12  ;;  %v3013_v15 = vsel %vm302_vm3, 1.0, %v2879_v7  ;;  %vm3075_vm7 = vmand %vm162_vm5, %vm164_vm6  ;;  %vm853_vm11 = vcmp.eq.s32.totalorder %v3006_v14, 2  ;;  %vm1127_vm12 = vcmp.eq.s32.totalorder %v3006_v14, 3  ;;  %vm579_vm13 = vcmp.eq.s32.totalorder %v3006_v14, 1  ;;  %s3621_s28 = sld [smem:[#allocation4 + $0x4]] }
  0x18   :  { %74 = vadd.xlane.f32.xlu0 %v73_v5  ;;  %2470 = vmatprep.mubr.msk.bf16.mxu1 %vm2880_vm1, %v2879_v7  ;;  %vm163_vm8 = vcmp.eq.s32.totalorder %v161_v55, %v3006_v14  ;;  %v3100_v9 = vsel %vm853_vm11, 1.0, %v2879_v7  ;;  %v3107_v10 = vsel %vm1127_vm12, 1.0, %v2879_v7  ;;  %v3110_v11 = vsel %vm579_vm13, 1.0, %v2879_v7  ;;  %s3631_s29 = sld [smem:[#allocation4 + $0x5]] }
  0x19   :  { %306 = vrot.lane.b32.xlu1 %v3013_v15, %s2881_s1  ;;  %2467 = vmatpush3.bf16.msra.mxu1 %v2666_v39  ;;  %vm3087_vm10 = vmand %vm163_vm8, %vm165_vm9  ;;  %vm2092_vm5 = vcmp.eq.s32.totalorder %v3063_v52, 1  ;;  %vm2135_vm6 = vcmp.eq.s32.totalorder %v3067_v54, 8  ;;  %vm2141_vm8 = vcmp.eq.s32.totalorder %v3067_v54, 9  ;;  %s3634_s30 = sld [smem:[#allocation4 + $0xc]]  ;;  %vm2104_vm9 = vcmp.eq.s32.totalorder %v3063_v52, 3 }
  0x1a   :  { %2468 = vmatprep.subr.bf16.mxu1 %v2879_v7  ;;  %s3639_s16 = sld [smem:[#allocation4 + $0x6]]  ;;  %vm2110_vm11 = vcmp.eq.s32.totalorder %v3063_v52, 4  ;;  %vm2153_vm12 = vcmp.eq.s32.totalorder %v3067_v54, 11  ;;  %vm2116_vm13 = vcmp.eq.s32.totalorder %v3063_v52, 5 }
  0x1b   :  { %s3643_s17 = sld [smem:[#allocation4 + $0xd]] }
  0x1c   :  { %s3648_s18 = sld [smem:[#allocation4 + $0x7]] }
  0x1d   :  { %2469 = vmatpush3.bf16.msra.mxu1 %v2667_v43 }
  0x1e   :  { %2480 = vmatprep.subr.bf16.mxu1 %v2879_v7 }
  0x8b   :  { %v3027_v35 = vpop.permute.xlu1 %306 }
  0x9d   :  { %v72_v16 = vpop.xlane.xlu0 %71 }
  0x9e   :  { %v77_v17 = vmul.f32 0.03125, %v72_v16 }
  0xa0   :  { %v79_v18 = vadd.f32 1e-06, %v77_v17 }
  0xa1   :  { %v75_v19 = vpop.xlane.xlu0 %74 }
  0xa2   :  { %2688 = vrsqrt.f32 %v79_v18  ;;  %v78_v20 = vmul.f32 0.03125, %v75_v19 }
  0xa4   :  { %v80_v21 = vadd.f32 1e-06, %v78_v20 }
  0xa6   :  { %2690 = vrsqrt.f32 %v80_v21 }
  0xaf   :  { %v2689_v22 = vpop.eup %2688 }
  0xb0   :  { %v83_v23 = vmul.f32 %v2689_v22, %v64_v0 }
  0xb2   :  { %v91_v27 = vmul.f32 %v2297_v25, %v83_v23 }
  0xb3   :  { %v2691_v24 = vpop.eup %2690 }
  0xb4   :  { %v84_v26 = vmul.f32 %v2691_v24, %v65_v1 }
  0xb6   :  { %v92_v28 = vmul.f32 %v2297_v25, %v84_v26 }
  0xb8   :  { %v97_v29 = vpack.c.bf16 %v92_v28, %v91_v27 }
  0xba   :  { %2457 = vmatmul.mubr.msk.bf16.vlgmr.msra.gmra.mxu0 %vm69_vm0, %v97_v29 }
  0xbb   :  { %2476 = vmatprep.mubr.msk.bf16.mxu0 %vm2880_vm1, %v2879_v7 }
  0xd7   :  { %v217_v30 = vpop.f32.mrf.mxu1 }
  0xd8   :  { %226 = vrot.lane.b32.xlu0 %v217_v30, %s2882_s20  ;;  %224 = vst.msk [vmem:[#allocation2] sm:$0x3] %vm223_vm4, %v217_v30 }
  0xd9   :  { %v2464_v31 = vpop.f32.mrf.mxu1 }
  0xdb   :  { %v220_v32 = vpop.f32.mrf.mxu1 }
  0xdd   :  { %v2465_v33 = vpop.f32.mrf.mxu1 }
 0x14a   :  { %v227_v37 = vpop.permute.xlu0 %226 }
 0x14b   :  { %229 = vst.msk [vmem:[#allocation2 + $0x2] sm:$0x3] %vm223_vm4, %v227_v37 }
 0x17a   :  { %v3025_v34 = vpop.f32.mrf.mxu0 }
 0x17b   :  { %v309_v40 = vmul.f32 %v3027_v35, %v3025_v34 }
 0x17c   :  { %v2458_v36 = vpop.f32.mrf.mxu0 }
 0x17e   :  { %v3029_v38 = vpop.f32.mrf.mxu0 }
 0x17f   :  { %v310_v41 = vmul.f32 %v3027_v35, %v3029_v38  ;;  %v3052_v48 = vpack.c.bf16 %v3029_v38, %v3025_v34 }
 0x180   :  { %v2459_v42 = vpop.f32.mrf.mxu0 }
 0x181   :  { %v317_v44 = vpack.c.bf16 %v310_v41, %v309_v40 }
 0x183   :  { %319 = vrot.lane.b32.xlu1 %v317_v44, %s2882_s20 }
 0x187   :  { %230 = vrot.lane.b32.xlu1 %v217_v30, %s2883_s24 }
 0x18b   :  { %234 = vrot.lane.b32.xlu1 %v217_v30, %s2881_s1 }
 0x1f5   :  { %v320_v45 = vpop.permute.xlu1 %319 }
 0x1f6   :  { %v325_v46 = vsel %vm69_vm0, %v320_v45, 0 }
 0x1f7   :  { %2475 = vmatpush3.bf16.xpose.msra.mxu0 %v325_v46 }
 0x1f8   :  { %2486 = vmatprep.subr.bf16.mxu0 %v2879_v7 }
 0x1f9   :  { %v231_v47 = vpop.permute.xlu1 %230 }
 0x1fa   :  { %233 = vst.msk [vmem:[#allocation2 + $0x4] sm:$0x3] %vm223_vm4, %v231_v47 }
 0x1fd   :  { %v235_v49 = vpop.permute.xlu1 %234 }
 0x1fe   :  { %237 = vst.msk [vmem:[#allocation2 + $0x6] sm:$0x3] %vm223_vm4, %v235_v49  ;;  %2477 = vmatmul.mubr.msk.bf16.vlgmr.msra.gmra.mxu0 %vm69_vm0, %v3052_v48  ;;  %vm529_vm4 = vcmask 1043456  }
 0x1ff   :  { %2488 = vmatprep.mubr.msk.bf16.mxu0 %vm2880_vm1, %v2879_v7 }
 0x205   :  { %v238_v50 = vld [vmem:[#allocation2] sm:$0xff] }
 0x206   :  { %v243_v51 = vpack.c.bf16 %v238_v50, %v238_v50 }
 0x208   :  { %2471 = vmatmul.mubr.msk.bf16.vlgmr.msra.gmra.mxu1 %vm69_vm0, %v243_v51 }
 0x209   :  { %2482 = vmatprep.mubr.msk.bf16.mxu1 %vm2880_vm1, %v2879_v7 }
 0x2be   :  { %v361_v56 = vpop.f32.mrf.mxu0 }
 0x2bf   :  { %v368_v58 = vmul.f32 0.35355338, %v361_v56 }
 0x2c0   :  { %v2478_v59 = vpop.f32.mrf.mxu0 }
 0x2c1   :  { %v370_v60 = vsel %vm3075_vm7, %v368_v58, -1e+30 }
 0x2c2   :  { %v364_v61 = vpop.f32.mrf.mxu0  ;;  %v372_v62 = vsel %vm179_vm2, %v370_v60, -inf }
 0x2c3   :  { %v369_v0 = vmul.f32 0.35355338, %v364_v61  ;;  %373 = vmax.xlane.f32.xlu1 %v372_v62 }
 0x2c4   :  { %v2479_v1 = vpop.f32.mrf.mxu0 }
 0x2c5   :  { %v371_v2 = vsel %vm3087_vm10, %v369_v0, -1e+30 }
 0x2c6   :  { %v375_v3 = vsel %vm179_vm2, %v371_v2, -inf }
 0x2c7   :  { %376 = vmax.xlane.f32.xlu0 %v375_v3 }
 0x2c8   :  { %v3094_v4 = vpop.f32.mrf.mxu1 }
 0x2c9   :  { %v396_v33 = vmul.f32 %v3027_v35, %v3094_v4 }
 0x2ca   :  { %v2472_v5 = vpop.f32.mrf.mxu1 }
 0x2cb   :  { %v398_v42 = vpack.c.bf16 %v396_v33, %v396_v33 }
 0x2cc   :  { %v296_v6 = vpop.f32.mrf.mxu1 }
 0x2ce   :  { %v2473_v8 = vpop.f32.mrf.mxu1 }
 0x2d4   :  { %311 = vrot.lane.b32.xlu1 %v3013_v15, %s2883_s24 }
 0x2d8   :  { %857 = vrot.lane.b32.xlu1 %v3100_v9, %s2881_s1 }
 0x2dc   :  { %1131 = vrot.lane.b32.xlu1 %v3107_v10, %s2881_s1 }
 0x2dd   :  { %583 = vrot.lane.b32.xlu0 %v3110_v11, %s2881_s1 }
 0x34c   :  { %v374_v12 = vpop.xlane.xlu1 %373 }
 0x34d   :  { %v378_v15 = vsub.f32 %v370_v60, %v374_v12 }
 0x34f   :  { %v380_v16 = vmul.f32 1.442695, %v378_v15 }
 0x350   :  { %v377_v17 = vpop.xlane.xlu0 %376  ;;  %v3118_v23 = vpop.permute.xlu1 %311 }
 0x351   :  { %2692 = vpow2.f32 %v380_v16  ;;  %v379_v14 = vsub.f32 %v371_v2, %v377_v17  ;;  %v314_v24 = vmul.f32 %v3118_v23, %v3025_v34  ;;  %v315_v25 = vmul.f32 %v3118_v23, %v3029_v38 }
 0x353   :  { %v382_v18 = vmul.f32 1.442695, %v379_v14  ;;  %v395_v29 = vpack.c.bf16 %v315_v25, %v314_v24 }
 0x354   :  { %v584_v26 = vpop.permute.xlu0 %583  ;;  %v858_v30 = vpop.permute.xlu1 %857 }
 0x355   :  { %2694 = vpow2.f32 %v382_v18  ;;  %v586_v27 = vmul.f32 %v584_v26, %v3025_v34  ;;  %v587_v28 = vmul.f32 %v584_v26, %v3029_v38  ;;  %v717_v31 = vmul.f32 %v584_v26, %v3094_v4 }
 0x356   :  { %v991_v36 = vmul.f32 %v858_v30, %v3094_v4  ;;  %v860_v40 = vmul.f32 %v858_v30, %v3025_v34  ;;  %v861_v41 = vmul.f32 %v858_v30, %v3029_v38 }
 0x357   :  { %v593_v32 = vpack.c.bf16 %v587_v28, %v586_v27  ;;  %v719_v37 = vpack.c.bf16 %v717_v31, %v717_v31  ;;  %v397_v28 = vmul.f32 %v3118_v23, %v3094_v4 }
 0x358   :  { %v1132_v39 = vpop.permute.xlu1 %1131  ;;  %v993_v44 = vpack.c.bf16 %v991_v36, %v991_v36  ;;  %v867_v46 = vpack.c.bf16 %v861_v41, %v860_v40 }
 0x359   :  { %v1265_v43 = vmul.f32 %v1132_v39, %v3094_v4  ;;  %v1134_v45 = vmul.f32 %v1132_v39, %v3025_v34  ;;  %v1135_v35 = vmul.f32 %v1132_v39, %v3029_v38 }
 0x35b   :  { %v1267_v47 = vpack.c.bf16 %v1265_v43, %v1265_v43  ;;  %v1141_v49 = vpack.c.bf16 %v1135_v35, %v1134_v45 }
 0x35e   :  { %v2693_v19 = vpop.eup %2692 }
 0x35f   :  { %v384_v20 = vsel %vm179_vm2, %v2693_v19, 0.0 }
 0x360   :  { %385 = vadd.xlane.f32.xlu1 %v384_v20  ;;  %v299_v20 = vand.u32 1, %v3002_v13 }
 0x362   :  { %v2695_v21 = vpop.eup %2694  ;;  %vm3192_vm14 = vcmp.eq.s32.totalorder %v160_v53, %v299_v20  ;;  %vm3204_vm3 = vcmp.eq.s32.totalorder %v161_v55, %v299_v20 }
 0x363   :  { %v387_v22 = vsel %vm179_vm2, %v2695_v21, 0.0 }
 0x364   :  { %388 = vadd.xlane.f32.xlu0 %v387_v22 }
 0x371   :  { %474 = vrot.lane.b32.xlu1 %v395_v29, %s2883_s24 }
 0x375   :  { %595 = vrot.lane.b32.xlu1 %v593_v32, %s2882_s20 }
 0x379   :  { %721 = vrot.lane.b32.xlu1 %v719_v37, %s2882_s20 }
 0x37a   :  { %400 = vrot.lane.b32.xlu0 %v398_v42, %s2882_s20  ;;  %v2658_v42 = vpack.i.bf16 %v3100_v9, %v3110_v11 }
 0x37d   :  { %995 = vrot.lane.b32.xlu1 %v993_v44, %s2882_s20 }
 0x37e   :  { %869 = vrot.lane.b32.xlu0 %v867_v46, %s2882_s20 }
 0x381   :  { %1269 = vrot.lane.b32.xlu1 %v1267_v47, %s2882_s20 }
 0x382   :  { %1143 = vrot.lane.b32.xlu0 %v1141_v49, %s2882_s20 }
 0x3e9   :  { %v386_v50 = vpop.xlane.xlu1 %385 }
 0x3ea   :  { %2696 = vrcp.f32 %v386_v50 }
 0x3ed   :  { %v475_v51 = vpop.permute.xlu1 %474  ;;  %v389_v56 = vpop.xlane.xlu0 %388 }
 0x3ee   :  { %2487 = vmatpush3.bf16.msra.mxu0 %v475_v51  ;;  %2698 = vrcp.f32 %v389_v56 }
 0x3ef   :  { %2498 = vmatprep.subr.bf16.mxu0 %v2879_v7 }
 0x3f1   :  { %v401_v58 = vpop.permute.xlu0 %400  ;;  %v596_v1 = vpop.permute.xlu1 %595 }
 0x3f2   :  { %v403_v59 = vsel %vm69_vm0, %v401_v58, 0  ;;  %v598_v3 = vsel %vm69_vm0, %v596_v1, 0 }
 0x3f3   :  { %2481 = vmatpush3.bf16.xpose.msra.mxu1 %v403_v59 }
 0x3f4   :  { %2492 = vmatprep.subr.bf16.mxu1 %v2879_v7 }
 0x3f5   :  { %v722_v5 = vpop.permute.xlu1 %721  ;;  %v870_v8 = vpop.permute.xlu0 %869 }
 0x3f6   :  { %v724_v6 = vsel %vm69_vm0, %v722_v5, 0  ;;  %v872_v12 = vsel %vm69_vm0, %v870_v8, 0 }
 0x3f7   :  { %v2697_v60 = vpop.eup %2696 }
 0x3f8   :  { %v392_v62 = vmul.f32 %v2697_v60, %v2693_v19 }
 0x3f9   :  { %v996_v15 = vpop.permute.xlu1 %995  ;;  %v1144_v17 = vpop.permute.xlu0 %1143 }
 0x3fa   :  { %2483 = vmatmul.mubr.msk.bf16.vlgmr.msra.gmra.mxu1 %vm69_vm0, %v3052_v48  ;;  %v998_v16 = vsel %vm69_vm0, %v996_v15, 0  ;;  %v1146_v14 = vsel %vm69_vm0, %v1144_v17, 0 }
 0x3fb   :  { %v2699_v61 = vpop.eup %2698  ;;  %2494 = vmatprep.mubr.msk.bf16.mxu1 %vm2880_vm1, %v2879_v7 }
 0x3fc   :  { %v393_v0 = vmul.f32 %v2699_v61, %v2695_v21 }
 0x3fd   :  { %v1270_v18 = vpop.permute.xlu1 %1269 }
 0x3fe   :  { %v394_v2 = vpack.c.bf16 %v393_v0, %v392_v62  ;;  %v1272_v19 = vsel %vm69_vm0, %v1270_v18, 0 }
 0x400   :  { %2489 = vmatmul.mubr.msk.bf16.vlgmr.msra.gmra.mxu0 %vm179_vm2, %v394_v2 }
 0x401   :  { %2499 = vmatpush3.bf16.xpose.msra.mxu0 %v598_v3  ;;  %2500 = vmatprep.mubr.msk.bf16.mxu0 %vm2880_vm1, %v2879_v7 }
 0x402   :  { %2510 = vmatprep.subr.bf16.mxu0 %v2879_v7 }
 0x408   :  { %2501 = vmatmul.mubr.msk.bf16.vlgmr.msra.gmra.mxu0 %vm69_vm0, %v3052_v48 }
 0x409   :  { %2511 = vmatpush3.bf16.xpose.msra.mxu0 %v724_v6  ;;  %2512 = vmatprep.mubr.msk.bf16.mxu0 %vm2880_vm1, %v2879_v7 }
 0x40a   :  { %2522 = vmatprep.subr.bf16.mxu0 %v2879_v7 }
 0x410   :  { %2513 = vmatmul.mubr.msk.bf16.vlgmr.msra.gmra.mxu0 %vm69_vm0, %v3052_v48 }
 0x411   :  { %2523 = vmatpush3.bf16.xpose.msra.mxu0 %v872_v12  ;;  %2524 = vmatprep.mubr.msk.bf16.mxu0 %vm2880_vm1, %v2879_v7 }
 0x412   :  { %2534 = vmatprep.subr.bf16.mxu0 %v2879_v7 }
 0x418   :  { %2525 = vmatmul.mubr.msk.bf16.vlgmr.msra.gmra.mxu0 %vm69_vm0, %v3052_v48 }
 0x419   :  { %2535 = vmatpush3.bf16.xpose.msra.mxu0 %v998_v16  ;;  %2536 = vmatprep.mubr.msk.bf16.mxu0 %vm2880_vm1, %v2879_v7 }
 0x41a   :  { %2546 = vmatprep.subr.bf16.mxu0 %v2879_v7 }
 0x420   :  { %2537 = vmatmul.mubr.msk.bf16.vlgmr.msra.gmra.mxu0 %vm69_vm0, %v3052_v48 }
 0x421   :  { %2547 = vmatpush3.bf16.xpose.msra.mxu0 %v1146_v14  ;;  %2548 = vmatprep.mubr.msk.bf16.mxu0 %vm2880_vm1, %v2879_v7 }
 0x422   :  { %2558 = vmatprep.subr.bf16.mxu0 %v2879_v7 }
 0x428   :  { %2549 = vmatmul.mubr.msk.bf16.vlgmr.msra.gmra.mxu0 %vm69_vm0, %v3052_v48 }
 0x429   :  { %2559 = vmatpush3.bf16.xpose.msra.mxu0 %v1272_v19  ;;  %2560 = vmatprep.mubr.msk.bf16.mxu0 %vm2880_vm1, %v2879_v7 }
 0x42a   :  { %2570 = vmatprep.subr.bf16.mxu0 %v2879_v7 }
 0x430   :  { %2561 = vmatmul.mubr.msk.bf16.vlgmr.msra.gmra.mxu0 %vm69_vm0, %v3052_v48 }
 0x431   :  { %2574 = vmatprep.mubr.msk.bf16.mxu0 %vm2880_vm1, %v2879_v7 }
 0x4ba   :  { %v439_v21 = vpop.f32.mrf.mxu1 }
 0x4bb   :  { %v446_v24 = vmul.f32 0.35355338, %v439_v21 }
 0x4bc   :  { %v2484_v25 = vpop.f32.mrf.mxu1 }
 0x4bd   :  { %v3198_v26 = vsel %vm3192_vm14, %v446_v24, -1e+30 }
 0x4be   :  { %v442_v48 = vpop.f32.mrf.mxu1  ;;  %v451_v27 = vsel %vm450_vm15, %v3198_v26, -inf }
 0x4bf   :  { %v447_v53 = vmul.f32 0.35355338, %v442_v48  ;;  %452 = vmax.xlane.f32.xlu0 %v451_v27 }
 0x4c0   :  { %v2485_v29 = vpop.f32.mrf.mxu1  ;;  %v3208_v30 = vpop.f32.mrf.mxu0 }
 0x4c1   :  { %v3212_v31 = vsel %vm3204_vm3, %v447_v53, -1e+30  ;;  %v522_v53 = vpack.c.bf16 %v397_v28, %v397_v28 }
 0x4c2   :  { %v2490_v32 = vpop.f32.mrf.mxu0  ;;  %v454_v33 = vsel %vm450_vm15, %v3212_v31, -inf }
 0x4c3   :  { %455 = vmax.xlane.f32.xlu1 %v454_v33 }
 0x4c4   :  { %v3216_v36 = vpop.f32.mrf.mxu0 }
 0x4c6   :  { %v2491_v55 = vpop.f32.mrf.mxu0 }
 0x4c8   :  { %v3218_v37 = vpop.f32.mrf.mxu0 }
 0x4ca   :  { %v2502_v39 = vpop.f32.mrf.mxu0 }
 0x4cc   :  { %v3220_v40 = vpop.f32.mrf.mxu0 }
 0x4ce   :  { %v2503_v41 = vpop.f32.mrf.mxu0 }
 0x4d0   :  { %v760_v43 = vpop.f32.mrf.mxu0 }
 0x4d1   :  { %v767_v3 = vmul.f32 0.35355338, %v760_v43 }
 0x4d2   :  { %v2514_v44 = vpop.f32.mrf.mxu0 }
 0x4d3   :  { %v3243_v17 = vsel %vm3192_vm14, %v767_v3, -1e+30 }
 0x4d4   :  { %v763_v45 = vpop.f32.mrf.mxu0  ;;  %2659 = vrot.lane.b32.xlu1 %v2658_v42, %s2883_s24  ;;  %v771_v19 = vsel %vm450_vm15, %v3243_v17, -inf }
 0x4d5   :  { %v768_v35 = vmul.f32 0.35355338, %v763_v45 }
 0x4d6   :  { %v2515_v46 = vpop.f32.mrf.mxu0 }
 0x4d7   :  { %v3227_v47 = vsel %vm3204_vm3, %v768_v35, -1e+30 }
 0x4d8   :  { %v908_v49 = vpop.f32.mrf.mxu0  ;;  %v774_v3 = vsel %vm450_vm15, %v3227_v47, -inf }
 0x4d9   :  { %v915_v15 = vmul.f32 0.35355338, %v908_v49 }
 0x4da   :  { %v2526_v50 = vpop.f32.mrf.mxu0 }
 0x4db   :  { %v3253_v24 = vsel %vm3075_vm7, %v915_v15, -1e+30 }
 0x4dc   :  { %v3229_v51 = vpop.f32.mrf.mxu0  ;;  %v919_v25 = vsel %vm179_vm2, %v3253_v24, -inf }
 0x4de   :  { %v2527_v56 = vpop.f32.mrf.mxu0 }
 0x4e0   :  { %v1034_v58 = vpop.f32.mrf.mxu0 }
 0x4e1   :  { %v1041_v21 = vmul.f32 0.35355338, %v1034_v58  ;;  %v642_v58 = vmul.f32 0.35355338, %v3220_v40 }
 0x4e2   :  { %v2538_v59 = vpop.f32.mrf.mxu0 }
 0x4e3   :  { %v3259_v48 = vsel %vm3192_vm14, %v1041_v21, -1e+30 }
 0x4e4   :  { %v1037_v60 = vpop.f32.mrf.mxu0  ;;  %v1045_v27 = vsel %vm450_vm15, %v3259_v48, -inf }
 0x4e5   :  { %v1042_v9 = vmul.f32 0.35355338, %v1037_v60 }
 0x4e6   :  { %v2539_v11 = vpop.f32.mrf.mxu0 }
 0x4e7   :  { %v3233_v61 = vsel %vm3204_vm3, %v1042_v9, -1e+30  ;;  %v644_v9 = vsel %vm3087_vm10, %v642_v58, -1e+30 }
 0x4e8   :  { %v1182_v62 = vpop.f32.mrf.mxu0  ;;  %v648_v11 = vsel %vm179_vm2, %v644_v9, -inf }
 0x4e9   :  { %v1189_v29 = vmul.f32 0.35355338, %v1182_v62 }
 0x4ea   :  { %v2550_v0 = vpop.f32.mrf.mxu0 }
 0x4eb   :  { %v3268_v32 = vsel %vm3075_vm7, %v1189_v29, -1e+30 }
 0x4ec   :  { %v3235_v1 = vpop.f32.mrf.mxu0  ;;  %v1193_v22 = vsel %vm179_vm2, %v3268_v32, -inf }
 0x4ee   :  { %v2551_v2 = vpop.f32.mrf.mxu0 }
 0x4ef   :  { %v916_v2 = vmul.f32 0.35355338, %v3229_v51 }
 0x4f0   :  { %v1308_v5 = vpop.f32.mrf.mxu0 }
 0x4f1   :  { %v1315_v6 = vmul.f32 0.35355338, %v1308_v5 }
 0x4f2   :  { %v2562_v8 = vpop.f32.mrf.mxu0 }
 0x4f3   :  { %v3239_v12 = vsel %vm3192_vm14, %v1315_v6, -1e+30  ;;  %v1190_v6 = vmul.f32 0.35355338, %v3235_v1  ;;  %v1048_v8 = vsel %vm450_vm15, %v3233_v61, -inf  ;;  %vm2159_vm14 = vcmp.eq.s32.totalorder %v3067_v54, 12 }
 0x4f4   :  { %v1311_v16 = vpop.f32.mrf.mxu0  ;;  %v1319_v33 = vsel %vm450_vm15, %v3239_v12, -inf }
 0x4f5   :  { %v1316_v14 = vmul.f32 0.35355338, %v1311_v16  ;;  %v3308_v15 = vsel %vm3087_vm10, %v1190_v6, -1e+30 }
 0x4f6   :  { %v2563_v18 = vpop.f32.mrf.mxu0  ;;  %v1196_v51 = vsel %vm179_vm2, %v3308_v15, -inf }
 0x4f7   :  { %v3249_v20 = vsel %vm3204_vm3, %v1316_v14, -1e+30  ;;  %vm2165_vm3 = vcmp.eq.s32.totalorder %v3067_v54, 13 }
 0x4f8   :  { %772 = vmax.xlane.f32.xlu1 %v771_v19  ;;  %v1322_v16 = vsel %vm450_vm15, %v3249_v20, -inf }
 0x4fc   :  { %920 = vmax.xlane.f32.xlu1 %v919_v25 }
 0x500   :  { %1046 = vmax.xlane.f32.xlu1 %v1045_v27 }
 0x511   :  { %524 = vrot.lane.b32.xlu1 %v522_v53, %s2883_s24 }
 0x535   :  { %1194 = vmax.xlane.f32.xlu1 %v1193_v22 }
 0x539   :  { %1320 = vmax.xlane.f32.xlu1 %v1319_v33 }
 0x548   :  { %v453_v55 = vpop.xlane.xlu0 %452 }
 0x549   :  { %v457_v39 = vsub.f32 %v3198_v26, %v453_v55  ;;  %v641_v26 = vmul.f32 0.35355338, %v3218_v37 }
 0x54b   :  { %v459_v23 = vmul.f32 1.442695, %v457_v39  ;;  %v643_v59 = vsel %vm3075_vm7, %v641_v26, -1e+30  ;;  %vm2098_vm7 = vcmp.eq.s32.totalorder %v3063_v52, 2 }
 0x54c   :  { %v456_v41 = vpop.xlane.xlu1 %455  ;;  %v645_v60 = vsel %vm179_vm2, %v643_v59, -inf }
 0x54d   :  { %2700 = vpow2.f32 %v459_v23  ;;  %v458_v42 = vsub.f32 %v3212_v31, %v456_v41 }
 0x54f   :  { %v461_v43 = vmul.f32 1.442695, %v458_v42 }
 0x550   :  { %v3276_v44 = vpop.permute.xlu1 %2659 }
 0x551   :  { %2702 = vpow2.f32 %v461_v43  ;;  %v2661_v45 = vunpack.i.l.bf16 %v3276_v44 }
 0x553   :  { %v718_v35 = vmul.f32 %v2661_v45, %v3094_v4  ;;  %v591_v14 = vmul.f32 %v2661_v45, %v3025_v34  ;;  %v592_v1 = vmul.f32 %v2661_v45, %v3029_v38 }
 0x555   :  { %v796_v46 = vpack.c.bf16 %v718_v35, %v718_v35  ;;  %v668_v18 = vpack.c.bf16 %v592_v1, %v591_v14 }
 0x557   :  { %798 = vrot.lane.b32.xlu1 %v796_v46, %s2883_s24 }
 0x55a   :  { %v2701_v49 = vpop.eup %2700 }
 0x55b   :  { %v463_v50 = vsel %vm450_vm15, %v2701_v49, 0.0 }
 0x55c   :  { %464 = vadd.xlane.f32.xlu0 %v463_v50 }
 0x55e   :  { %v2703_v56 = vpop.eup %2702 }
 0x55f   :  { %v466_v31 = vsel %vm450_vm15, %v2703_v56, 0.0 }
 0x560   :  { %467 = vadd.xlane.f32.xlu0 %v466_v31 }
 0x564   :  { %646 = vmax.xlane.f32.xlu0 %v645_v60 }
 0x568   :  { %649 = vmax.xlane.f32.xlu0 %v648_v11 }
 0x57e   :  { %1136 = vrot.lane.b32.xlu0 %v3107_v10, %s2883_s24  ;;  %v918_v10 = vsel %vm3087_vm10, %v916_v2, -1e+30  ;;  %vm2147_vm10 = vcmp.eq.s32.totalorder %v3067_v54, 10 }
 0x57f   :  { %v922_v5 = vsel %vm179_vm2, %v918_v10, -inf }
 0x581   :  { %v773_v37 = vpop.xlane.xlu1 %772 }
 0x582   :  { %v777_v21 = vsub.f32 %v3243_v17, %v773_v37 }
 0x584   :  { %v779_v28 = vmul.f32 1.442695, %v777_v21 }
 0x585   :  { %v921_v62 = vpop.xlane.xlu1 %920 }
 0x586   :  { %v925_v26 = vsub.f32 %v3253_v24, %v921_v62 }
 0x588   :  { %v927_v60 = vmul.f32 1.442695, %v925_v26 }
 0x589   :  { %v3293_v0 = vpop.xlane.xlu1 %1046 }
 0x58d   :  { %v525_v40 = vpop.permute.xlu1 %524 }
 0x58e   :  { %v531_v57 = vsel %vm529_vm4, %v525_v40, 0 }
 0x58f   :  { %2493 = vmatpush3.bf16.msra.mxu1 %v531_v57 }
 0x590   :  { %2504 = vmatprep.subr.bf16.mxu1 %v2879_v7 }
 0x59d   :  { %775 = vmax.xlane.f32.xlu0 %v774_v3 }
 0x5a1   :  { %923 = vmax.xlane.f32.xlu0 %v922_v5 }
 0x5a5   :  { %1049 = vmax.xlane.f32.xlu0 %v1048_v8 }
 0x5a9   :  { %1197 = vmax.xlane.f32.xlu0 %v1196_v51 }
 0x5ad   :  { %1323 = vmax.xlane.f32.xlu0 %v1322_v16 }
 0x5c3   :  { %670 = vrot.lane.b32.xlu0 %v668_v18, %s2883_s24 }
 0x5e5   :  { %v465_v19 = vpop.xlane.xlu0 %464 }
 0x5e6   :  { %2704 = vrcp.f32 %v465_v19 }
 0x5e9   :  { %v468_v63 = vpop.xlane.xlu0 %467 }
 0x5ea   :  { %2706 = vrcp.f32 %v468_v63 }
 0x5ed   :  { %v647_v25 = vpop.xlane.xlu0 %646 }
 0x5ee   :  { %v651_v27 = vsub.f32 %v643_v59, %v647_v25  ;;  %v1051_v59 = vsub.f32 %v3259_v48, %v3293_v0 }
 0x5f0   :  { %v653_v53 = vmul.f32 1.442695, %v651_v27  ;;  %v1053_v57 = vmul.f32 1.442695, %v1051_v59 }
 0x5f1   :  { %v650_v29 = vpop.xlane.xlu0 %649 }
 0x5f2   :  { %2708 = vpow2.f32 %v653_v53  ;;  %v652_v22 = vsub.f32 %v644_v9, %v650_v29  ;;  %v2662_v29 = vunpack.i.h.bf16 %v3276_v44 }
 0x5f3   :  { %2710 = vpow2.f32 %v779_v28  ;;  %v2705_v55 = vpop.eup %2704 }
 0x5f4   :  { %v655_v33 = vmul.f32 1.442695, %v652_v22  ;;  %v471_v23 = vmul.f32 %v2705_v55, %v2701_v49 }
 0x5f5   :  { %v3333_v50 = vpop.permute.xlu0 %1136 }
 0x5f6   :  { %2712 = vpow2.f32 %v655_v33  ;;  %v1140_v44 = vmul.f32 %v3333_v50, %v3029_v38 }
 0x5f7   :  { %v2707_v39 = vpop.eup %2706 }
 0x5f8   :  { %v472_v41 = vmul.f32 %v2707_v39, %v2703_v56  ;;  %v1195_v56 = vpop.xlane.xlu1 %1194  ;;  %v992_v39 = vmul.f32 %v2662_v29, %v3094_v4 }
 0x5f9   :  { %v1199_v9 = vsub.f32 %v3268_v32, %v1195_v56  ;;  %v865_v56 = vmul.f32 %v2662_v29, %v3025_v34 }
 0x5fa   :  { %v521_v42 = vpack.c.bf16 %v472_v41, %v471_v23  ;;  %v1139_v41 = vmul.f32 %v3333_v50, %v3025_v34 }
 0x5fb   :  { %v1201_v2 = vmul.f32 1.442695, %v1199_v9 }
 0x5fc   :  { %2495 = vmatmul.mubr.msk.bf16.vlgmr.msra.gmra.mxu1 %vm450_vm15, %v521_v42  ;;  %v1321_v62 = vpop.xlane.xlu1 %1320 }
 0x5fd   :  { %2506 = vmatprep.mubr.msk.bf16.mxu1 %vm2880_vm1, %v2879_v7  ;;  %v1325_v32 = vsub.f32 %v3239_v12, %v1321_v62 }
 0x5ff   :  { %v3321_v17 = vpop.eup %2708  ;;  %v1327_v51 = vmul.f32 1.442695, %v1325_v32 }
 0x600   :  { %v657_v43 = vsel %vm179_vm2, %v3321_v17, 0.0  ;;  %v3325_v45 = vpop.eup %2710  ;;  %v799_v59 = vpop.permute.xlu1 %798 }
 0x601   :  { %658 = vadd.xlane.f32.xlu1 %v657_v43  ;;  %v783_v46 = vsel %vm450_vm15, %v3325_v45, 0.0  ;;  %v1070_v43 = vpack.c.bf16 %v992_v39, %v992_v39 }
 0x603   :  { %v3327_v35 = vpop.eup %2712 }
 0x604   :  { %v660_v49 = vsel %vm179_vm2, %v3327_v35, 0.0 }
 0x605   :  { %784 = vadd.xlane.f32.xlu1 %v783_v46  ;;  %661 = vadd.xlane.f32.xlu0 %v660_v49  ;;  %v1266_v46 = vmul.f32 %v3333_v50, %v3094_v4  ;;  %v1216_v49 = vpack.c.bf16 %v1140_v44, %v1139_v41 }
 0x607   :  { %v1344_v26 = vpack.c.bf16 %v1266_v46, %v1266_v46 }
 0x626   :  { %v776_v31 = vpop.xlane.xlu0 %775 }
 0x627   :  { %v778_v58 = vsub.f32 %v3227_v47, %v776_v31  ;;  %v866_v31 = vmul.f32 %v2662_v29, %v3029_v38 }
 0x629   :  { %v781_v11 = vmul.f32 1.442695, %v778_v58  ;;  %v942_v58 = vpack.c.bf16 %v866_v31, %v865_v56 }
 0x62a   :  { %v924_v37 = vpop.xlane.xlu0 %923 }
 0x62b   :  { %2714 = vpow2.f32 %v781_v11  ;;  %v926_v40 = vsub.f32 %v918_v10, %v924_v37 }
 0x62c   :  { %2716 = vpow2.f32 %v927_v60 }
 0x62d   :  { %v929_v3 = vmul.f32 1.442695, %v926_v40 }
 0x62e   :  { %v1050_v5 = vpop.xlane.xlu0 %1049 }
 0x62f   :  { %2718 = vpow2.f32 %v929_v3  ;;  %v1052_v24 = vsub.f32 %v3233_v61, %v1050_v5 }
 0x630   :  { %2720 = vpow2.f32 %v1053_v57  ;;  %v804_v57 = vsel %vm529_vm4, %v799_v59, 0 }
 0x631   :  { %2722 = vpow2.f32 %v1201_v2  ;;  %v1055_v47 = vmul.f32 1.442695, %v1052_v24 }
 0x632   :  { %v1198_v48 = vpop.xlane.xlu0 %1197 }
 0x633   :  { %v1200_v0 = vsub.f32 %v3308_v15, %v1198_v48  ;;  %2724 = vpow2.f32 %v1055_v47 }
 0x635   :  { %v1203_v6 = vmul.f32 1.442695, %v1200_v0 }
 0x636   :  { %v1324_v10 = vpop.xlane.xlu0 %1323 }
 0x637   :  { %2726 = vpow2.f32 %v1203_v6  ;;  %v1326_v16 = vsub.f32 %v3249_v20, %v1324_v10 }
 0x638   :  { %v3343_v8 = vpop.eup %2714  ;;  %2728 = vpow2.f32 %v1327_v51 }
 0x639   :  { %v786_v61 = vsel %vm450_vm15, %v3343_v8, 0.0  ;;  %v3348_v14 = vpop.eup %2716  ;;  %v1329_v18 = vmul.f32 1.442695, %v1326_v16 }
 0x63a   :  { %787 = vadd.xlane.f32.xlu1 %v786_v61  ;;  %v671_v1 = vpop.permute.xlu0 %670  ;;  %v931_v19 = vsel %vm179_vm2, %v3348_v14, 0.0 }
 0x63b   :  { %2505 = vmatpush3.bf16.msra.mxu1 %v671_v1  ;;  %2730 = vpow2.f32 %v1329_v18 }
 0x63c   :  { %v3350_v15 = vpop.eup %2718  ;;  %2516 = vmatprep.subr.bf16.mxu1 %v2879_v7 }
 0x63d   :  { %v3353_v12 = vpop.eup %2720  ;;  %v934_v20 = vsel %vm179_vm2, %v3350_v15, 0.0 }
 0x63e   :  { %v3359_v63 = vpop.eup %2722  ;;  %932 = vadd.xlane.f32.xlu1 %v931_v19  ;;  %935 = vadd.xlane.f32.xlu0 %v934_v20  ;;  %v1057_v25 = vsel %vm450_vm15, %v3353_v12, 0.0 }
 0x63f   :  { %v1205_v21 = vsel %vm179_vm2, %v3359_v63, 0.0 }
 0x640   :  { %v3365_v27 = vpop.eup %2724 }
 0x641   :  { %v1060_v28 = vsel %vm450_vm15, %v3365_v27, 0.0 }
 0x642   :  { %1206 = vadd.xlane.f32.xlu1 %v1205_v21  ;;  %1058 = vadd.xlane.f32.xlu0 %v1057_v25 }
 0x644   :  { %v3369_v53 = vpop.eup %2726 }
 0x645   :  { %v1208_v22 = vsel %vm179_vm2, %v3369_v53, 0.0  ;;  %v3374_v33 = vpop.eup %2728 }
 0x646   :  { %1061 = vadd.xlane.f32.xlu0 %v1060_v28  ;;  %v1331_v55 = vsel %vm450_vm15, %v3374_v33, 0.0 }
 0x648   :  { %v3379_v23 = vpop.eup %2730 }
 0x649   :  { %v1334_v42 = vsel %vm450_vm15, %v3379_v23, 0.0 }
 0x64a   :  { %1209 = vadd.xlane.f32.xlu0 %v1208_v22 }
 0x64e   :  { %1332 = vadd.xlane.f32.xlu0 %v1331_v55 }
 0x652   :  { %1335 = vadd.xlane.f32.xlu0 %v1334_v42 }
 0x653   :  { %1072 = vrot.lane.b32.xlu1 %v1070_v43, %s2883_s24 }
 0x657   :  { %1218 = vrot.lane.b32.xlu1 %v1216_v49, %s2883_s24 }
 0x65b   :  { %1346 = vrot.lane.b32.xlu1 %v1344_v26, %s2883_s24 }
 0x668   :  { %944 = vrot.lane.b32.xlu0 %v942_v58, %s2883_s24 }
 0x68a   :  { %v659_v60 = vpop.xlane.xlu1 %658 }
 0x68b   :  { %2732 = vrcp.f32 %v659_v60 }
 0x68e   :  { %v662_v9 = vpop.xlane.xlu0 %661  ;;  %v785_v2 = vpop.xlane.xlu1 %784 }
 0x68f   :  { %2734 = vrcp.f32 %v662_v9 }
 0x690   :  { %2736 = vrcp.f32 %v785_v2 }
 0x698   :  { %v2733_v11 = vpop.eup %2732 }
 0x699   :  { %v665_v50 = vmul.f32 %v2733_v11, %v3321_v17 }
 0x69c   :  { %v2735_v4 = vpop.eup %2734 }
 0x69d   :  { %v666_v37 = vmul.f32 %v2735_v4, %v3327_v35  ;;  %v2737_v62 = vpop.eup %2736 }
 0x69e   :  { %v791_v32 = vmul.f32 %v2737_v62, %v3325_v45 }
 0x69f   :  { %v667_v40 = vpack.c.bf16 %v666_v37, %v665_v50 }
 0x6a1   :  { %2507 = vmatmul.mubr.msk.bf16.vlgmr.msra.gmra.mxu1 %vm179_vm2, %v667_v40 }
 0x6a2   :  { %2517 = vmatpush3.bf16.msra.mxu1 %v804_v57  ;;  %2518 = vmatprep.mubr.msk.bf16.mxu1 %vm2880_vm1, %v2879_v7 }
 0x6a3   :  { %2528 = vmatprep.subr.bf16.mxu1 %v2879_v7 }
 0x6bc   :  { %v3402_v34 = vpop.f32.mrf.mxu1 }
 0x6be   :  { %v2496_v38 = vpop.f32.mrf.mxu1 }
 0x6c0   :  { %v3404_v3 = vpop.f32.mrf.mxu1 }
 0x6c2   :  { %v2497_v17 = vpop.f32.mrf.mxu1 }
 0x6c3   :  { %v788_v35 = vpop.xlane.xlu1 %787 }
 0x6c4   :  { %2738 = vrcp.f32 %v788_v35 }
 0x6c7   :  { %v936_v5 = vpop.xlane.xlu0 %935  ;;  %v933_v24 = vpop.xlane.xlu1 %932 }
 0x6c8   :  { %2740 = vrcp.f32 %v933_v24 }
 0x6c9   :  { %2742 = vrcp.f32 %v936_v5 }
 0x6cb   :  { %v1059_v47 = vpop.xlane.xlu0 %1058  ;;  %v1207_v18 = vpop.xlane.xlu1 %1206 }
 0x6cf   :  { %v1062_v48 = vpop.xlane.xlu0 %1061  ;;  %v1073_v21 = vpop.permute.xlu1 %1072 }
 0x6d0   :  { %2744 = vrcp.f32 %v1062_v48  ;;  %v1078_v29 = vsel %vm529_vm4, %v1073_v21, 0 }
 0x6d1   :  { %v2739_v0 = vpop.eup %2738  ;;  %2746 = vrcp.f32 %v1059_v47 }
 0x6d2   :  { %v792_v6 = vmul.f32 %v2739_v0, %v3343_v8 }
 0x6d3   :  { %v1210_v10 = vpop.xlane.xlu0 %1209  ;;  %v1219_v41 = vpop.permute.xlu1 %1218 }
 0x6d4   :  { %v795_v51 = vpack.c.bf16 %v792_v6, %v791_v32  ;;  %2748 = vrcp.f32 %v1210_v10 }
 0x6d5   :  { %v2741_v61 = vpop.eup %2740  ;;  %2750 = vrcp.f32 %v1207_v18 }
 0x6d6   :  { %2519 = vmatmul.mubr.msk.bf16.vlgmr.msra.gmra.mxu1 %vm450_vm15, %v795_v51  ;;  %v2743_v1 = vpop.eup %2742  ;;  %v939_v20 = vmul.f32 %v2741_v61, %v3348_v14 }
 0x6d7   :  { %v1333_v16 = vpop.xlane.xlu0 %1332  ;;  %2530 = vmatprep.mubr.msk.bf16.mxu1 %vm2880_vm1, %v2879_v7  ;;  %v940_v45 = vmul.f32 %v2743_v1, %v3350_v15 }
 0x6d9   :  { %v941_v25 = vpack.c.bf16 %v940_v45, %v939_v20 }
 0x6db   :  { %v1336_v19 = vpop.xlane.xlu0 %1335 }
 0x6dc   :  { %2752 = vrcp.f32 %v1336_v19 }
 0x6dd   :  { %v2745_v28 = vpop.eup %2744  ;;  %2754 = vrcp.f32 %v1333_v16 }
 0x6de   :  { %v2747_v22 = vpop.eup %2746  ;;  %v1066_v14 = vmul.f32 %v2745_v28, %v3365_v27  ;;  %v1347_v27 = vpop.permute.xlu1 %1346 }
 0x6df   :  { %v945_v8 = vpop.permute.xlu0 %944  ;;  %v1065_v15 = vmul.f32 %v2747_v22, %v3353_v12  ;;  %v1352_v12 = vsel %vm529_vm4, %v1347_v27, 0  ;;  %vm2128_vm4 = vcmp.eq.s32.totalorder %v3063_v52, 7 }
 0x6e0   :  { %2529 = vmatpush3.bf16.msra.mxu1 %v945_v8 }
 0x6e1   :  { %2540 = vmatprep.subr.bf16.mxu1 %v2879_v7  ;;  %v1069_v55 = vpack.c.bf16 %v1066_v14, %v1065_v15  ;;  %v2749_v39 = vpop.eup %2748 }
 0x6e2   :  { %v2751_v44 = vpop.eup %2750  ;;  %v1214_v42 = vmul.f32 %v2749_v39, %v3369_v53 }
 0x6e3   :  { %2531 = vmatmul.mubr.msk.bf16.vlgmr.msra.gmra.mxu1 %vm179_vm2, %v941_v25  ;;  %v1213_v43 = vmul.f32 %v2751_v44, %v3359_v63  ;;  %v2668_v63 = vld [vmem:[%s3715_s4 + $0x8] sm:$0xff]  }
 0x6e4   :  { %2541 = vmatpush3.bf16.msra.mxu1 %v1078_v29  ;;  %2542 = vmatprep.mubr.msk.bf16.mxu1 %vm2880_vm1, %v2879_v7 }
 0x6e5   :  { %2552 = vmatprep.subr.bf16.mxu1 %v2879_v7  ;;  %v1215_v46 = vpack.c.bf16 %v1214_v42, %v1213_v43  ;;  %2571 = vmatpush3.bf16.msra.mxu0 %v2668_v63 }
 0x6e6   :  { %2572 = vmatprep.subr.bf16.mxu0 %v2879_v7 }
 0x6e9   :  { %v2753_v49 = vpop.eup %2752 }
 0x6ea   :  { %v2755_v26 = vpop.eup %2754  ;;  %v1340_v56 = vmul.f32 %v2753_v49, %v3379_v23  ;;  %v2669_v23 = vld [vmem:[%s3715_s4] sm:$0xff]  }
 0x6eb   :  { %2543 = vmatmul.mubr.msk.bf16.vlgmr.msra.gmra.mxu1 %vm450_vm15, %v1069_v55  ;;  %v1339_v53 = vmul.f32 %v2755_v26, %v3374_v33  ;;  %2573 = vmatpush3.bf16.msra.mxu0 %v2669_v23  ;;  %v574_v33 = vstv %s3722_s11  ;;  %s3627_s11 = sld [smem:[#allocation4 + $0xb]] }
 0x6ec   :  { %2553 = vmatpush3.bf16.msra.mxu1 %v1219_v41  ;;  %2554 = vmatprep.mubr.msk.bf16.mxu1 %vm2880_vm1, %v2879_v7  ;;  %v575_v58 = vmul.f32 %v574_v33, %v3402_v34  ;;  %v576_v60 = vmul.f32 %v574_v33, %v3404_v3 }
 0x6ed   :  { %2564 = vmatprep.subr.bf16.mxu1 %v2879_v7  ;;  %v1343_v31 = vpack.c.bf16 %v1340_v56, %v1339_v53  ;;  %2586 = vmatprep.subr.bf16.mxu0 %v2879_v7  ;;  %v3466_v53 = vld [vmem:[%s3711_s0] sm:$0xff] }
 0x6ee   :  { %v577_v59 = vadd.f32 %v575_v58, %v3208_v30  ;;  %v578_v50 = vadd.f32 %v576_v60, %v3216_v36  ;;  %v3476_v58 = vld [vmem:[%s3711_s0 + $0x8] sm:$0xff] }
 0x6f3   :  { %2555 = vmatmul.mubr.msk.bf16.vlgmr.msra.gmra.mxu1 %vm179_vm2, %v1215_v46  ;;  %vm1605_vm2 = vcmask 523264  }
 0x6f4   :  { %2565 = vmatpush3.bf16.msra.mxu1 %v1352_v12  ;;  %2566 = vmatprep.mubr.msk.bf16.mxu1 %vm2880_vm1, %v2879_v7 }
 0x6f5   :  { %2578 = vmatprep.subr.bf16.mxu1 %v2879_v7 }
 0x6fb   :  { %2567 = vmatmul.mubr.msk.bf16.vlgmr.msra.gmra.mxu1 %vm450_vm15, %v1343_v31  ;;  %vm2122_vm15 = vcmp.eq.s32.totalorder %v3063_v52, 6 }
 0x6fc   :  { %2582 = vmatprep.mubr.msk.bf16.mxu1 %vm2880_vm1, %v2879_v7 }
 0x761   :  { %v710_v9 = vpop.f32.mrf.mxu1 }
 0x762   :  { %v793_v11 = vadd.f32 %v710_v9, %v577_v59  ;;  %v851_v5 = vadd.f32 %v710_v9, %v3208_v30 }
 0x763   :  { %v2508_v4 = vpop.f32.mrf.mxu1 }
 0x765   :  { %v713_v37 = vpop.f32.mrf.mxu1 }
 0x766   :  { %v794_v40 = vadd.f32 %v713_v37, %v578_v50  ;;  %v852_v62 = vadd.f32 %v713_v37, %v3216_v36  ;;  %v2670_v50 = vld [vmem:[%s3716_s5 + $0x8] sm:$0xff]   ;;  %v2671_v37 = vld [vmem:[%s3716_s5] sm:$0xff]  }
 0x767   :  { %v2509_v57 = vpop.f32.mrf.mxu1  ;;  %2579 = vmatpush3.bf16.msra.mxu1 %v2670_v50 }
 0x768   :  { %2580 = vmatprep.subr.bf16.mxu1 %v2879_v7 }
 0x76b   :  { %2581 = vmatpush3.bf16.msra.mxu1 %v2671_v37 }
 0x76c   :  { %2598 = vmatprep.subr.bf16.mxu1 %v2879_v7 }
 0x796   :  { %v840_v38 = vpop.f32.mrf.mxu1 }
 0x797   :  { %v847_v1 = vmul.f32 %v840_v38, %v574_v33 }
 0x798   :  { %v2520_v2 = vpop.f32.mrf.mxu1 }
 0x799   :  { %v849_v45 = vadd.f32 %v847_v1, %v793_v11 }
 0x79a   :  { %v843_v17 = vpop.f32.mrf.mxu1 }
 0x79b   :  { %v848_v19 = vmul.f32 %v843_v17, %v574_v33 }
 0x79c   :  { %v2521_v35 = vpop.f32.mrf.mxu1 }
 0x79d   :  { %v850_v21 = vadd.f32 %v848_v19, %v794_v40 }
 0x7a3   :  { %v984_v24 = vpop.f32.mrf.mxu1 }
 0x7a4   :  { %v1125_v34 = vadd.f32 %v984_v24, %v851_v5  ;;  %v1067_v22 = vadd.f32 %v984_v24, %v849_v45 }
 0x7a5   :  { %v2532_v47 = vpop.f32.mrf.mxu1 }
 0x7a6   :  { %v3497_v47 = vld [vmem:[%s3720_s9] ss:$0 sm:$0xff] }
 0x7a7   :  { %v987_v3 = vpop.f32.mrf.mxu1 }
 0x7a8   :  { %v1126_v48 = vadd.f32 %v987_v3, %v852_v62  ;;  %v1068_v14 = vadd.f32 %v987_v3, %v850_v21 }
 0x7a9   :  { %v2533_v0 = vpop.f32.mrf.mxu1 }
 0x7ab   :  { %v1114_v32 = vpop.f32.mrf.mxu1 }
 0x7ac   :  { %v1121_v36 = vmul.f32 %v1114_v32, %v574_v33  ;;  %v2672_v32 = vld [vmem:[%s3717_s6 + $0x18] sm:$0xff]  }
 0x7ad   :  { %v2544_v6 = vpop.f32.mrf.mxu1 }
 0x7ae   :  { %v1123_v55 = vadd.f32 %v1121_v36, %v1067_v22  ;;  %v2673_v6 = vld [vmem:[%s3717_s6 + $0x10] sm:$0xff]  }
 0x7af   :  { %v1117_v10 = vpop.f32.mrf.mxu1 }
 0x7b0   :  { %v1122_v25 = vmul.f32 %v1117_v10, %v574_v33  ;;  %v2674_v10 = vld [vmem:[%s3717_s6 + $0x8] sm:$0xff]  }
 0x7b1   :  { %v2545_v51 = vpop.f32.mrf.mxu1 }
 0x7b2   :  { %v1124_v39 = vadd.f32 %v1122_v25, %v1068_v14  ;;  %v2675_v51 = vld [vmem:[%s3717_s6] sm:$0xff]  }
 0x7b3   :  { %v1258_v16 = vpop.f32.mrf.mxu1 }
 0x7b4   :  { %v3454_v61 = vadd.f32 %v1258_v16, %v1125_v34  ;;  %v1341_v42 = vadd.f32 %v1258_v16, %v1123_v55 }
 0x7b5   :  { %v2556_v18 = vpop.f32.mrf.mxu1 }
 0x7b7   :  { %v1261_v20 = vpop.f32.mrf.mxu1 }
 0x7b8   :  { %v3456_v30 = vadd.f32 %v1261_v20, %v1126_v48  ;;  %v1342_v43 = vadd.f32 %v1261_v20, %v1124_v39 }
 0x7b9   :  { %v2557_v8 = vpop.f32.mrf.mxu1 }
 0x7ba   :  { %v1744_v28 = vpack.c.bf16 %v3456_v30, %v3454_v61 }
 0x7bb   :  { %v1388_v29 = vpop.f32.mrf.mxu1 }
 0x7bc   :  { %v1395_v41 = vmul.f32 %v1388_v29, %v574_v33 }
 0x7bd   :  { %v2568_v15 = vpop.f32.mrf.mxu1 }
 0x7be   :  { %v1397_v49 = vadd.f32 %v1395_v41, %v1341_v42 }
 0x7bf   :  { %v1391_v44 = vpop.f32.mrf.mxu1 }
 0x7c0   :  { %v1396_v27 = vmul.f32 %v1391_v44, %v574_v33 }
 0x7c1   :  { %v2569_v46 = vpop.f32.mrf.mxu1 }
 0x7c2   :  { %v1398_v12 = vadd.f32 %v1396_v27, %v1342_v43 }
 0x7c4   :  { %v1405_v26 = vpack.c.bf16 %v1398_v12, %v1397_v49 }
 0x7c6   :  { %2575 = vmatmul.mubr.msk.bf16.vlgmr.msra.gmra.mxu0 %vm69_vm0, %v1405_v26 }
 0x7c7   :  { %2594 = vmatprep.mubr.msk.bf16.mxu0 %vm2880_vm1, %v2879_v7  ;;  %2587 = vmatpush3.bf16.msra.mxu0 %v2672_v32 }
 0x7c8   :  { %2588 = vmatprep.subr.bf16.mxu0 %v2879_v7 }
 0x7cb   :  { %2589 = vmatpush3.bf16.msra.mxu0 %v2673_v6 }
 0x7cc   :  { %2590 = vmatprep.subr.bf16.mxu0 %v2879_v7 }
 0x7cf   :  { %2591 = vmatpush3.bf16.msra.mxu0 %v2674_v10 }
 0x7d0   :  { %2592 = vmatprep.subr.bf16.mxu0 %v2879_v7 }
 0x7d3   :  { %2593 = vmatpush3.bf16.msra.mxu0 %v2675_v51 }
 0x7d4   :  { %2614 = vmatprep.subr.bf16.mxu0 %v2879_v7 }
 0x886   :  { %v1455_v56 = vpop.f32.mrf.mxu0 }
 0x887   :  { %v3469_v31 = vadd.f32 %v3466_v53, %v1455_v56 }
 0x888   :  { %v2576_v63 = vpop.f32.mrf.mxu0 }
 0x889   :  { %v1465_v23 = vmul.f32 %v3469_v31, %v3469_v31 }
 0x88a   :  { %v1458_v33 = vpop.f32.mrf.mxu0 }
 0x88b   :  { %v3479_v59 = vadd.f32 %v3476_v58, %v1458_v33  ;;  %v1467_v60 = vsel %vm69_vm0, %v1465_v23, 0.0 }
 0x88c   :  { %1468 = vadd.xlane.f32.xlu1 %v1467_v60  ;;  %v2577_v9 = vpop.f32.mrf.mxu0 }
 0x88d   :  { %v1466_v11 = vmul.f32 %v3479_v59, %v3479_v59 }
 0x88f   :  { %v1470_v4 = vsel %vm69_vm0, %v1466_v11, 0.0  ;;  %v2676_v11 = vld [vmem:[%s3718_s7 + $0x8] sm:$0xff]  }
 0x890   :  { %1471 = vadd.xlane.f32.xlu0 %v1470_v4 }
 0x915   :  { %v1469_v40 = vpop.xlane.xlu1 %1468 }
 0x916   :  { %v1473_v57 = vmul.f32 0.03125, %v1469_v40 }
 0x918   :  { %v1475_v38 = vadd.f32 1e-06, %v1473_v57 }
 0x919   :  { %v1472_v2 = vpop.xlane.xlu0 %1471 }
 0x91a   :  { %2756 = vrsqrt.f32 %v1475_v38  ;;  %v1474_v17 = vmul.f32 0.03125, %v1472_v2 }
 0x91c   :  { %v1476_v35 = vadd.f32 1e-06, %v1474_v17 }
 0x91e   :  { %2758 = vrsqrt.f32 %v1476_v35  ;;  %v3541_v35 = vld [vmem:[%s3721_s10] ss:$0 sm:$0xff]  ;;  %s3657_s10 = sld [smem:[#allocation4 + $0xf]] }
 0x927   :  { %v2757_v5 = vpop.eup %2756 }
 0x928   :  { %v1479_v24 = vmul.f32 %v2757_v5, %v3469_v31 }
 0x92a   :  { %v1487_v3 = vmul.f32 %v3497_v47, %v1479_v24 }
 0x92b   :  { %v2759_v34 = vpop.eup %2758 }
 0x92c   :  { %v1480_v62 = vmul.f32 %v2759_v34, %v3479_v59 }
 0x92e   :  { %v1488_v48 = vmul.f32 %v3497_v47, %v1480_v62  ;;  %v2678_v62 = vld [vmem:[%s3715_s4 + $0x8] sm:$0xff]  }
 0x930   :  { %v1493_v0 = vpack.c.bf16 %v1488_v48, %v1487_v3  ;;  %v2679_v48 = vld [vmem:[%s3715_s4] sm:$0xff]   ;;  %s3651_s4 = sld [smem:[#allocation4 + $0xe]] }
 0x932   :  { %2583 = vmatmul.mubr.msk.bf16.vlgmr.msra.gmra.mxu1 %vm69_vm0, %v1493_v0 }
 0x933   :  { %2602 = vmatprep.mubr.msk.bf16.mxu1 %vm2880_vm1, %v2879_v7  ;;  %2599 = vmatpush3.bf16.msra.mxu1 %v2676_v11 }
 0x934   :  { %2600 = vmatprep.subr.bf16.mxu1 %v2879_v7 }
 0x9f2   :  { %v1543_v16 = vpop.f32.mrf.mxu1 }
 0x9f3   :  { %1564 = vrot.lane.b32.xlu1 %v1543_v16, %s2883_s24  ;;  %v1550_v20 = vsub.f32 0.0, %v1543_v16 }
 0x9f4   :  { %v2584_v1 = vpop.f32.mrf.mxu1 }
 0x9f5   :  { %v1552_v8 = vmul.f32 1.442695, %v1550_v20 }
 0x9f6   :  { %v1546_v18 = vpop.f32.mrf.mxu1 }
 0x9f7   :  { %1566 = vrot.lane.b32.xlu0 %v1546_v18, %s2883_s24  ;;  %v1551_v45 = vsub.f32 0.0, %v1546_v18  ;;  %2760 = vpow2.f32 %v1552_v8 }
 0x9f8   :  { %v2585_v19 = vpop.f32.mrf.mxu1 }
 0x9f9   :  { %v1554_v21 = vmul.f32 1.442695, %v1551_v45 }
 0x9fb   :  { %2762 = vpow2.f32 %v1554_v21 }
 0xa04   :  { %v2761_v36 = vpop.eup %2760 }
 0xa05   :  { %v1556_v29 = vadd.f32 1.0, %v2761_v36 }
 0xa07   :  { %2764 = vrcp.f32 %v1556_v29 }
 0xa08   :  { %v2763_v25 = vpop.eup %2762 }
 0xa09   :  { %v1557_v22 = vadd.f32 1.0, %v2763_v25 }
 0xa0b   :  { %2766 = vrcp.f32 %v1557_v22 }
 0xa14   :  { %v2765_v14 = vpop.eup %2764 }
 0xa15   :  { %v1560_v39 = vmul.f32 %v2765_v14, %v1543_v16 }
 0xa18   :  { %v2767_v15 = vpop.eup %2766 }
 0xa19   :  { %v1561_v41 = vmul.f32 %v2767_v15, %v1546_v18 }
 0xa65   :  { %v1565_v55 = vpop.permute.xlu1 %1564 }
 0xa66   :  { %v1570_v42 = vmul.f32 %v1565_v55, %v1560_v39 }
 0xa69   :  { %v1567_v44 = vpop.permute.xlu0 %1566 }
 0xa6a   :  { %v1571_v43 = vmul.f32 %v1567_v44, %v1561_v41 }
 0xa6c   :  { %v1580_v27 = vpack.c.bf16 %v1571_v43, %v1570_v42  ;;  %v2682_v43 = vld [vmem:[%s3717_s6 + $0x18] sm:$0xff]  }
 0xa6e   :  { %2595 = vmatmul.mubr.msk.bf16.vlgmr.msra.gmra.mxu0 %vm1605_vm2, %v1580_v27  ;;  %v2683_v27 = vld [vmem:[%s3717_s6 + $0x10] sm:$0xff]  }
 0xa6f   :  { %2618 = vmatprep.mubr.msk.bf16.mxu0 %vm2880_vm1, %v2879_v7 }
 0xb2e   :  { %v1643_v46 = vpop.f32.mrf.mxu0 }
 0xb2f   :  { %v1650_v49 = vadd.f32 %v1643_v46, %v3469_v31  ;;  %v2677_v31 = vld [vmem:[%s3718_s7] sm:$0xff]  }
 0xb30   :  { %v2596_v12 = vpop.f32.mrf.mxu0  ;;  %2601 = vmatpush3.bf16.msra.mxu1 %v2677_v31  ;;  %v2685_v46 = vld [vmem:[%s3717_s6] sm:$0xff]  }
 0xb31   :  { %v1653_v26 = vmul.f32 %v1650_v49, %v1650_v49  ;;  %2606 = vmatprep.subr.bf16.mxu1 %v2879_v7 }
 0xb32   :  { %v1646_v56 = vpop.f32.mrf.mxu0 }
 0xb33   :  { %v1651_v63 = vadd.f32 %v1646_v56, %v3479_v59  ;;  %v1655_v23 = vsel %vm69_vm0, %v1653_v26, 0.0 }
 0xb34   :  { %1656 = vadd.xlane.f32.xlu1 %v1655_v23  ;;  %v2597_v33 = vpop.f32.mrf.mxu0 }
 0xb35   :  { %v1654_v60 = vmul.f32 %v1651_v63, %v1651_v63 }
 0xb37   :  { %v1658_v9 = vsel %vm69_vm0, %v1654_v60, 0.0 }
 0xb38   :  { %1659 = vadd.xlane.f32.xlu0 %v1658_v9 }
 0xbbd   :  { %v1657_v59 = vpop.xlane.xlu1 %1656 }
 0xbbe   :  { %v1661_v4 = vmul.f32 0.03125, %v1657_v59 }
 0xbc0   :  { %v1663_v50 = vadd.f32 1e-06, %v1661_v4 }
 0xbc1   :  { %v1660_v37 = vpop.xlane.xlu0 %1659 }
 0xbc2   :  { %2768 = vrsqrt.f32 %v1663_v50  ;;  %v1662_v40 = vmul.f32 0.03125, %v1660_v37 }
 0xbc4   :  { %v1664_v57 = vadd.f32 1e-06, %v1662_v40 }
 0xbc6   :  { %2770 = vrsqrt.f32 %v1664_v57 }
 0xbcf   :  { %v2769_v38 = vpop.eup %2768 }
 0xbd0   :  { %v1667_v2 = vmul.f32 %v2769_v38, %v1650_v49 }
 0xbd2   :  { %v1675_v24 = vmul.f32 %v3541_v35, %v1667_v2 }
 0xbd3   :  { %v2771_v17 = vpop.eup %2770 }
 0xbd4   :  { %v1668_v5 = vmul.f32 %v2771_v17, %v1651_v63 }
 0xbd6   :  { %v1676_v34 = vmul.f32 %v3541_v35, %v1668_v5 }
 0xbd8   :  { %v1681_v3 = vpack.c.bf16 %v1676_v34, %v1675_v24 }
 0xbda   :  { %2603 = vmatmul.mubr.msk.bf16.vlgmr.msra.gmra.mxu1 %vm69_vm0, %v1681_v3  ;;  %v2095_v3 = vstv %s2360_s23 }
 0xbdb   :  { %2607 = vmatpush3.bf16.msra.mxu1 %v2678_v62  ;;  %2610 = vmatprep.mubr.msk.bf16.mxu1 %vm2880_vm1, %v2879_v7 }
 0xbdc   :  { %2608 = vmatprep.subr.bf16.mxu1 %v2879_v7 }
 0xbdf   :  { %2609 = vmatpush3.bf16.msra.mxu1 %v2679_v48  ;;  %v2137_v48 = vstv %s2367_s3 }
 0xbe0   :  { %2622 = vmatprep.subr.bf16.mxu1 %v2879_v7 }
 0xbe2   :  { %2611 = vmatmul.mubr.msk.bf16.vlgmr.msra.gmra.mxu1 %vm69_vm0, %v1744_v28 }
 0xbe3   :  { %2630 = vmatprep.mubr.msk.bf16.mxu1 %vm2880_vm1, %v2879_v7  ;;  %2623 = vmatpush3.bf16.msra.mxu1 %v2682_v43 }
 0xbe4   :  { %2624 = vmatprep.subr.bf16.mxu1 %v2879_v7 }
 0xbe7   :  { %2625 = vmatpush3.bf16.msra.mxu1 %v2683_v27 }
 0xbe8   :  { %2626 = vmatprep.subr.bf16.mxu1 %v2879_v7 }
 0xc9a   :  { %v3562_v0 = vpop.f32.mrf.mxu1 }
 0xc9b   :  { %1738 = vst [vmem:[#allocation7] sm:$0xff] %v3562_v0 }
 0xc9c   :  { %v2604_v32 = vpop.f32.mrf.mxu1 }
 0xc9e   :  { %v3565_v6 = vpop.f32.mrf.mxu1 }
 0xc9f   :  { %1739 = vst [vmem:[#allocation7 + $0x8] sm:$0xff] %v3565_v6 }
 0xca0   :  { %v2605_v10 = vpop.f32.mrf.mxu1 }
 0xca2   :  { %v1794_v51 = vpop.f32.mrf.mxu1 }
 0xca3   :  { %v3569_v16 = vadd.f32 %v3466_v53, %v1794_v51  ;;  %v2680_v53 = vld [vmem:[%s3716_s5 + $0x8] sm:$0xff]   ;;  %v2101_v51 = vstv %s2361_s25 }
 0xca4   :  { %v2612_v61 = vpop.f32.mrf.mxu1  ;;  %2615 = vmatpush3.bf16.msra.mxu0 %v2680_v53 }
 0xca5   :  { %v1804_v30 = vmul.f32 %v3569_v16, %v3569_v16  ;;  %2616 = vmatprep.subr.bf16.mxu0 %v2879_v7 }
 0xca6   :  { %v1797_v28 = vpop.f32.mrf.mxu1 }
 0xca7   :  { %v3574_v1 = vadd.f32 %v3476_v58, %v1797_v28  ;;  %v1806_v18 = vsel %vm69_vm0, %v1804_v30, 0.0  ;;  %v2681_v58 = vld [vmem:[%s3716_s5] sm:$0xff]   ;;  %v2139_v30 = vsel %vm2135_vm6, %v2137_v48, 4294967196  ;;  %v2143_v28 = vstv %s2368_s12 }
 0xca8   :  { %1807 = vadd.xlane.f32.xlu1 %v1806_v18  ;;  %v2613_v19 = vpop.f32.mrf.mxu1  ;;  %2617 = vmatpush3.bf16.msra.mxu0 %v2681_v58  ;;  %v2145_v53 = vsel %vm2141_vm8, %v2143_v28, %v2139_v30  ;;  %v2149_v58 = vstv %s3619_s27 }
 0xca9   :  { %v1805_v20 = vmul.f32 %v3574_v1, %v3574_v1  ;;  %2634 = vmatprep.subr.bf16.mxu0 %v2879_v7 }
 0xcab   :  { %v1809_v45 = vsel %vm69_vm0, %v1805_v20, 0.0 }
 0xcac   :  { %1810 = vadd.xlane.f32.xlu1 %v1809_v45  ;;  %v2107_v45 = vstv %s2362_s26 }
 0xd31   :  { %v1808_v8 = vpop.xlane.xlu1 %1807 }
 0xd32   :  { %v1812_v21 = vmul.f32 0.03125, %v1808_v8 }
 0xd34   :  { %v1814_v36 = vadd.f32 1e-06, %v1812_v21  ;;  %v2113_v21 = vstv %s3621_s28 }
 0xd35   :  { %v1811_v25 = vpop.xlane.xlu1 %1810 }
 0xd36   :  { %2772 = vrsqrt.f32 %v1814_v36  ;;  %v1813_v29 = vmul.f32 0.03125, %v1811_v25  ;;  %v2151_v25 = vsel %vm2147_vm10, %v2149_v58, %v2145_v53 }
 0xd38   :  { %v1815_v22 = vadd.f32 1e-06, %v1813_v29  ;;  %v2155_v29 = vstv %s3627_s11 }
 0xd3a   :  { %2774 = vrsqrt.f32 %v1815_v22 }
 0xd43   :  { %v2773_v14 = vpop.eup %2772 }
 0xd44   :  { %v1818_v15 = vmul.f32 %v2773_v14, %v3569_v16  ;;  %v2119_v14 = vstv %s3631_s29 }
 0xd46   :  { %v1826_v41 = vmul.f32 %v3497_v47, %v1818_v15  ;;  %v2157_v15 = vsel %vm2153_vm12, %v2155_v29, %v2151_v25 }
 0xd47   :  { %v2775_v55 = vpop.eup %2774 }
 0xd48   :  { %v1819_v39 = vmul.f32 %v2775_v55, %v3574_v1  ;;  %v2161_v55 = vstv %s3634_s30 }
 0xd49   :  { %v2163_v27 = vsel %vm2159_vm14, %v2161_v55, %v2157_v15 }
 0xd4a   :  { %v1827_v44 = vmul.f32 %v3497_v47, %v1819_v39  ;;  %v2684_v47 = vld [vmem:[%s3717_s6 + $0x8] sm:$0xff]   ;;  %s2088_s6 = sld [smem:[#allocation4]] }
 0xd4b   :  { %2627 = vmatpush3.bf16.msra.mxu1 %v2684_v47  ;;  %v2167_v47 = vstv %s3643_s17 }
 0xd4c   :  { %v1832_v42 = vpack.c.bf16 %v1827_v44, %v1826_v41  ;;  %2628 = vmatprep.subr.bf16.mxu1 %v2879_v7 }
 0xd4e   :  { %2619 = vmatmul.mubr.msk.bf16.vlgmr.msra.gmra.mxu0 %vm69_vm0, %v1832_v42  ;;  %v2125_v42 = vstv %s3639_s16 }
 0xd4f   :  { %2638 = vmatprep.mubr.msk.bf16.mxu0 %vm2880_vm1, %v2879_v7  ;;  %2629 = vmatpush3.bf16.msra.mxu1 %v2685_v46  ;;  %vm2086_vm1 = vcmp.eq.s32.totalorder %v3063_v52, 0 }
 0xd50   :  { %v2089_v24 = vstv %s2088_s6 }
 0xd51   :  { %v2090_v62 = vsel %vm2086_vm1, %v2089_v24, 4294967196  ;;  %vm2177_vm1 = vcmp.eq.s32.totalorder %v3067_v54, 15 }
 0xd52   :  { %v2096_v10 = vsel %vm2092_vm5, %v2095_v3, %v2090_v62 }
 0xd53   :  { %v2102_v18 = vsel %vm2098_vm7, %v2101_v51, %v2096_v10 }
 0xd54   :  { %v2108_v8 = vsel %vm2104_vm9, %v2107_v45, %v2102_v18  ;;  %vm2220_vm9 = vcmask 7168  }
 0xd55   :  { %v2114_v22 = vsel %vm2110_vm11, %v2113_v21, %v2108_v8 }
 0xd56   :  { %v2120_v44 = vsel %vm2116_vm13, %v2119_v14, %v2114_v22 }
 0xe0e   :  { %v1882_v49 = vpop.f32.mrf.mxu0 }
 0xe0f   :  { %1903 = vrot.lane.b32.xlu0 %v1882_v49, %s2883_s24  ;;  %v1889_v63 = vsub.f32 0.0, %v1882_v49 }
 0xe10   :  { %v2620_v12 = vpop.f32.mrf.mxu0 }
 0xe11   :  { %v1891_v33 = vmul.f32 1.442695, %v1889_v63  ;;  %v2126_v12 = vsel %vm2122_vm15, %v2125_v42, %v2120_v44  ;;  %v2169_v63 = vsel %vm2165_vm3, %v2167_v47, %v2163_v27 }
 0xe12   :  { %v1885_v26 = vpop.f32.mrf.mxu0 }
 0xe13   :  { %1905 = vrot.lane.b32.xlu1 %v1885_v26, %s2883_s24  ;;  %v1890_v23 = vsub.f32 0.0, %v1885_v26  ;;  %2776 = vpow2.f32 %v1891_v33 }
 0xe14   :  { %v2621_v56 = vpop.f32.mrf.mxu0 }
 0xe15   :  { %v1893_v60 = vmul.f32 1.442695, %v1890_v23  ;;  %v2173_v23 = vstv %s3651_s4 }
 0xe17   :  { %2778 = vpow2.f32 %v1893_v60 }
 0xe20   :  { %v2777_v9 = vpop.eup %2776 }
 0xe21   :  { %v1895_v31 = vadd.f32 1.0, %v2777_v9 }
 0xe23   :  { %2780 = vrcp.f32 %v1895_v31  ;;  %v2179_v31 = vstv %s3657_s10 }
 0xe24   :  { %v2779_v11 = vpop.eup %2778 }
 0xe25   :  { %v1896_v59 = vadd.f32 1.0, %v2779_v11 }
 0xe27   :  { %2782 = vrcp.f32 %v1896_v59 }
 0xe2e   :  { %2184 = vmax.xlane.f32.xlu0 %v3565_v6 }
 0xe30   :  { %v2781_v4 = vpop.eup %2780 }
 0xe31   :  { %v1899_v40 = vmul.f32 %v2781_v4, %v1882_v49 }
 0xe34   :  { %v2783_v50 = vpop.eup %2782 }
 0xe35   :  { %v1900_v57 = vmul.f32 %v2783_v50, %v1885_v26 }
 0xe37   :  { %2182 = vmax.xlane.f32.xlu1 %v3562_v0 }
 0xe81   :  { %v1904_v37 = vpop.permute.xlu0 %1903 }
 0xe82   :  { %v1909_v2 = vmul.f32 %v1904_v37, %v1899_v40 }
 0xe85   :  { %v1906_v38 = vpop.permute.xlu1 %1905 }
 0xe86   :  { %v1910_v17 = vmul.f32 %v1906_v38, %v1900_v57 }
 0xe88   :  { %v1919_v5 = vpack.c.bf16 %v1910_v17, %v1909_v2 }
 0xe8a   :  { %2631 = vmatmul.mubr.msk.bf16.vlgmr.msra.gmra.mxu1 %vm1605_vm2, %v1919_v5  ;;  %vm2171_vm2 = vcmp.eq.s32.totalorder %v3067_v54, 14  ;;  %v2686_v54 = vld [vmem:[%s3718_s7 + $0x8] sm:$0xff]  }
 0xe8b   :  { %v2175_v11 = vsel %vm2171_vm2, %v2173_v23, %v2169_v63  ;;  %2635 = vmatpush3.bf16.msra.mxu0 %v2686_v54 }
 0xe8c   :  { %2636 = vmatprep.subr.bf16.mxu0 %v2879_v7 }
 0xeb7   :  { %v3629_v61 = vpop.xlane.xlu0 %2184 }
 0xeb8   :  { %v2187_v19 = vsub.f32 %v3565_v6, %v3629_v61 }
 0xeba   :  { %v2190_v36 = vmul.f32 1.442695, %v2187_v19 }
 0xec0   :  { %v3616_v34 = vpop.xlane.xlu1 %2182 }
 0xec1   :  { %v2186_v32 = vsub.f32 %v3562_v0, %v3616_v34 }
 0xec3   :  { %v2188_v20 = vmul.f32 1.442695, %v2186_v32 }
 0xec5   :  { %2784 = vpow2.f32 %v2188_v20 }
 0xec6   :  { %2786 = vpow2.f32 %v2190_v36 }
 0xed2   :  { %v2785_v59 = vpop.eup %2784 }
 0xed3   :  { %v2787_v4 = vpop.eup %2786 }
 0xf4a   :  { %v1981_v39 = vpop.f32.mrf.mxu1 }
 0xf4b   :  { %v3660_v41 = vadd.f32 %v1981_v39, %v3569_v16  ;;  %v2131_v16 = vstv %s3648_s18 }
 0xf4c   :  { %v2632_v43 = vpop.f32.mrf.mxu1  ;;  %v2132_v9 = vsel %vm2128_vm4, %v2131_v16, %v2126_v12 }
 0xf4d   :  { %v1991_v46 = vmul.f32 %v3660_v41, %v3660_v41  ;;  %vm2202_vm5 = vcmp.eq.s32.totalorder %v3002_v13, %v2132_v9  ;;  %vm2210_vm7 = vcmp.ge.s32.totalorder %v2132_v9, 0 }
 0xf4e   :  { %v1984_v49 = vpop.f32.mrf.mxu1  ;;  %v2204_v50 = vsel %vm2202_vm5, %v3562_v0, 0.0  ;;  %v2375_v40 = vsel %vm2210_vm7, 1.0, %v2879_v7 }
 0xf4f   :  { %v1989_v26 = vadd.f32 %v1984_v49, %v3574_v1  ;;  %v1993_v56 = vsel %vm69_vm0, %v1991_v46, 0.0  ;;  %v2181_v1 = vsel %vm2177_vm1, %v2179_v31, %v2175_v11 }
 0xf50   :  { %1994 = vadd.xlane.f32.xlu0 %v1993_v56  ;;  %v2633_v33 = vpop.f32.mrf.mxu1  ;;  %vm2203_vm6 = vcmp.eq.s32.totalorder %v3002_v13, %v2181_v1  ;;  %vm2211_vm8 = vcmp.ge.s32.totalorder %v2181_v1, 0  ;;  %v2687_v13 = vld [vmem:[%s3718_s7] sm:$0xff]   ;;  %s2884_s7 = smov [#allocation7]  }
 0xf51   :  { %v1992_v60 = vmul.f32 %v1989_v26, %v1989_v26  ;;  %v2205_v37 = vsel %vm2203_vm6, %v3565_v6, 0.0  ;;  %v2376_v0 = vsel %vm2211_vm8, 1.0, %v2879_v7  ;;  %v2234_v6 = vsel %vm2220_vm9, %v2375_v40, 0.0  ;;  %2637 = vmatpush3.bf16.msra.mxu0 %v2687_v13  ;;  %s2256_s19 = sshll.u32 %s2884_s7, 4  ;;  %s2257_s19 = int_to_ptr.vmem [resolvable:$true] %s2256_s19 }
 0xf52   :  { %v2235_v57 = vsel %vm2220_vm9, %v2376_v0, 0.0  ;;  %s2812_s20 = scalar_lea.vmem %s2257_s19, 256  ;;  %p2817_p6 = scmp.lt.s32.totalorder %s2257_s19, %s2257_s19 }
 0xf53   :  { %v1996_v52 = vsel %vm69_vm0, %v1992_v60, 0.0  ;;  %v2236_v38 = vadd.f32 %v2235_v57, %v2234_v6  ;;  %p2813_p5 = scmp.ne.s32.totalorder %s2257_s19, %s2812_s20  ;;  %p2818_p7 = scmp.lt.s32.totalorder %s2812_s20, %s2812_s20 }
 0xf54   :  { %2192 = vadd.xlane.f32.xlu0 %v2785_v59  ;;  %1997 = vadd.xlane.f32.xlu1 %v1996_v52 }
 0xf55   :  { %p2819_p8 = por %p2818_p7, %p2817_p6 }
 0xf57   :  { %p2820_p9 = pnand %p2819_p8, %p2813_p5 }
 0xf58   :  { %2206 = vadd.xlane.f32.xlu0 %v2204_v50  ;;  %2194 = vadd.xlane.f32.xlu1 %v2787_v4 }
 0xf5c   :  { %2208 = vadd.xlane.f32.xlu1 %v2205_v37 }
 0xf60   :  { %2237 = vadd.xlane.f32.xlu1 %v2236_v38 }
 0xfd9   :  { %v1995_v2 = vpop.xlane.xlu0 %1994 }
 0xfda   :  { %v1999_v17 = vmul.f32 0.03125, %v1995_v2 }
 0xfdc   :  { %v2001_v5 = vadd.f32 1e-06, %v1999_v17 }
 0xfdd   :  { %v2193_v24 = vpop.xlane.xlu0 %2192  ;;  %v1998_v62 = vpop.xlane.xlu1 %1997 }
 0xfde   :  { %2788 = vrsqrt.f32 %v2001_v5  ;;  %v2000_v3 = vmul.f32 0.03125, %v1998_v62 }
 0xfdf   :  { %2790 = vlog2.f32 %v2193_v24 }
 0xfe0   :  { %v2002_v7 = vadd.f32 1e-06, %v2000_v3 }
 0xfe1   :  { %v2195_v48 = vpop.xlane.xlu1 %2194  ;;  %v2207_v45 = vpop.xlane.xlu0 %2206 }
 0xfe2   :  { %2792 = vrsqrt.f32 %v2002_v7 }
 0xfe3   :  { %2794 = vlog2.f32 %v2195_v48 }
 0xfe5   :  { %v2209_v25 = vpop.xlane.xlu1 %2208 }
 0xfeb   :  { %v2789_v32 = vpop.eup %2788 }
 0xfec   :  { %v2791_v10 = vpop.eup %2790  ;;  %v2005_v30 = vmul.f32 %v2789_v32, %v3660_v41 }
 0xfed   :  { %v2197_v51 = vmul.f32 0.6931472, %v2791_v10 }
 0xfee   :  { %v2013_v8 = vmul.f32 %v3541_v35, %v2005_v30 }
 0xfef   :  { %v2793_v28 = vpop.eup %2792  ;;  %v2200_v18 = vadd.f32 %v2197_v51, %v3616_v34 }
 0xff0   :  { %v2795_v19 = vpop.eup %2794  ;;  %v2006_v20 = vmul.f32 %v2793_v28, %v1989_v26 }
 0xff1   :  { %v2216_v53 = vsub.f32 %v2200_v18, %v2207_v45  ;;  %v2199_v58 = vmul.f32 0.6931472, %v2795_v19 }
 0xff2   :  { %v2014_v21 = vmul.f32 %v3541_v35, %v2006_v20 }
 0xff3   :  { %v2201_v36 = vadd.f32 %v2199_v58, %v3629_v61  ;;  %v2218_v22 = vmul.f32 %v2375_v40, %v2216_v53 }
 0xff4   :  { %v2019_v29 = vpack.c.bf16 %v2014_v21, %v2013_v8 }
 0xff5   :  { %v2217_v14 = vsub.f32 %v2201_v36, %v2209_v25  ;;  %v2221_v34 = vsel %vm2220_vm9, %v2218_v22, 0.0 }
 0xff6   :  { %2639 = vmatmul.mubr.msk.bf16.vlgmr.msra.gmra.mxu0 %vm69_vm0, %v2019_v29 }
 0xff7   :  { %v2219_v15 = vmul.f32 %v2376_v0, %v2217_v14 }
 0xff9   :  { %v2222_v55 = vsel %vm2220_vm9, %v2219_v15, 0.0 }
 0xffa   :  { %v2223_v39 = vadd.f32 %v2222_v55, %v2221_v34 }
 0xffc   :  { %2224 = vadd.xlane.f32.xlu0 %v2223_v39 }
 0xffd   :  { %2823 = shalt.err (!%p2820_p9)
}
 0xffe   :  { %s2885_s8 = smov 128   ;;  %s2886_s21 = smov 8   ;;  %v2238_v35 = vpop.xlane.xlu1 %2237 }
 0xfff   :  { %2262 = dma.vmem_to_hbm [thread:$0]  %s2257_s19, 256, %s3724_s13, [#allocation5], %s2885_s8, %s2885_s8, %s2886_s21   ;;  %v2239_v61 = vrot.slane %v2238_v35, 4 }
0x1000   :  { %s2887_s6 = smov [#allocation8]  }
0x1001   :  { %v2240_v41 = vadd.f32 %v2239_v61, %v2238_v35  ;;  %s2268_s13 = sshll.u32 %s2887_s6, 4  ;;  %s2269_s13 = int_to_ptr.vmem [resolvable:$true] %s2268_s13 }
0x1002   :  { %s2832_s23 = scalar_lea.vmem %s2269_s13, 128  ;;  %p2837_p11 = scmp.lt.s32.totalorder %s2269_s13, %s2269_s13 }
0x1003   :  { %v2241_v44 = vrot.slane %v2240_v41, 2  ;;  %p2833_p10 = scmp.ne.s32.totalorder %s2269_s13, %s2832_s23  ;;  %p2838_p12 = scmp.lt.s32.totalorder %s2832_s23, %s2832_s23 }
0x1005   :  { %v2242_v47 = vadd.f32 %v2241_v44, %v2240_v41  ;;  %p2839_p13 = por %p2838_p12, %p2837_p11 }
0x1007   :  { %v2243_v12 = vrot.slane %v2242_v47, 1  ;;  %p2840_p0 = pnand %p2839_p13, %p2833_p10 }
0x1009   :  { %v2244_v56 = vadd.f32 %v2243_v12, %v2242_v47 }
0x1085   :  { %v2225_v42 = vpop.xlane.xlu0 %2224 }
0x1086   :  { %v2226_v43 = vrot.slane %v2225_v42, 4 }
0x1088   :  { %v2227_v27 = vadd.f32 %v2226_v43, %v2225_v42 }
0x108a   :  { %v2228_v46 = vrot.slane %v2227_v27, 2 }
0x108c   :  { %v2229_v49 = vadd.f32 %v2228_v46, %v2227_v27 }
0x108e   :  { %v2230_v16 = vrot.slane %v2229_v49, 1 }
0x1090   :  { %v2231_v26 = vadd.f32 %v2230_v16, %v2229_v49 }
0x1092   :  { %2642 = vpush %v2231_v26 }
0x1093   :  { %2644 = vpush %v2244_v56 }
0x10b6   :  { %v2069_v63 = vpop.f32.mrf.mxu0 }
0x10b8   :  { %v2640_v23 = vpop.f32.mrf.mxu0 }
0x10ba   :  { %v2072_v33 = vpop.f32.mrf.mxu0 }
0x10bb   :  { %v2382_v60 = vpack.c.bf16 %v2072_v33, %v2069_v63 }
0x10bc   :  { %v2641_v9 = vpop.f32.mrf.mxu0 }
0x10bd   :  { %2383 = vst [vmem:[#allocation8] sm:$0xff] %v2382_v60  }
0x10be   :  { %2843 = shalt.err (!%p2840_p0)
}
0x10bf   :  { %s2888_s3 = smov 4   ;;  %s2889_s28 = smov [#allocation10]   ;;  %vm2249_vm0 = vcmask 0  }
0x10c0   :  { %2274 = dma.vmem_to_hbm [thread:$0]  %s2269_s13, 128, %s3725_s14, [#allocation9], %s2883_s24, %s2883_s24, %s2888_s3  }
0x10c1   :  { %s2281_s11 = sshll.u32 %s2889_s28, 4  ;;  %s2282_s11 = int_to_ptr.vmem [resolvable:$true] %s2281_s11 }
0x10c2   :  { %s2852_s29 = scalar_lea.vmem %s2282_s11, 16  ;;  %s2856_s30 = scalar_lea.vmem %s2282_s11, 32 }
0x10c3   :  { %s2643_s26 = spop %2642  ;;  %p2853_p1 = scmp.ne.s32.totalorder %s2282_s11, %s2852_s29 }
0x10c4   :  { %s2645_s27 = spop %2644  ;;  %v2233_v59 = vstv %s2643_s26  ;;  %p2857_p2 = scmp.lt.s32.totalorder %s2282_s11, %s2282_s11 }
0x10c5   :  { %v2246_v11 = vstv %s2645_s27  ;;  %p2858_p3 = scmp.lt.s32.totalorder %s2856_s30, %s2852_s29 }
0x10c6   :  { %2796 = vrcp.f32 %v2246_v11 }
0x10c7   :  { %p2859_p4 = por %p2858_p3, %p2857_p2 }
0x10c9   :  { %p2860_p5 = pnand %p2859_p4, %p2853_p1 }
0x10d3   :  { %v2797_v31 = vpop.eup %2796 }
0x10d4   :  { %v2248_v52 = vmul.f32 %v2797_v31, %v2233_v59 }
0x10d6   :  { %2250 = vst.msk [vmem:[#allocation10] sm:$0x1] %vm2249_vm0, %v2248_v52 }
0x10d7   :  { %2863 = shalt.err (!%p2860_p5)
}
0x10d8   :  { %2284 = dma.vmem_to_hbm [thread:$0]  %s2282_s11, 16, %s3726_s15, [#allocation9]  }
0x10d9   :  { %2874 = dma.done.wait [#allocation5], 256  }
0x10da   :  { %2875 = vsyncadd [#allocation5], 4294967040 }
0x10db   :  { %2876 = dma.done.wait [#allocation9], 144  }
0x10dc   :  { %2877 = vsyncadd [#allocation9], 4294967152 }
0x10dd   :  { %2294 = vsyncpa [#allocation5], 1 }
0x10de   :  { %2295 = vsyncpa [#allocation9], 1 }
0x10df   :  { %2296 = vsyncpa [#allocation6], 1 }

</bundles_post_ra>
